<compile_context>
chip_gen: v7x
topology: tpu7x:2x2x1
jax: 0.10.0
libtpu: 0.0.40
codegen_flags: <defaults>
</compile_context>

<pallas_src>
import math
import jax
import jax.numpy as jnp
from jax import lax
from jax.experimental import pallas as pl
from jax.experimental.pallas import tpu as pltpu

HEADS = 8          # MultiHeadAttention default
LN_EPS = 1e-5      # torch.nn.LayerNorm default eps


def _layernorm(x):
    # LayerNorm over last dim, no affine (matches elementwise_affine=False)
    mean = jnp.mean(x, axis=-1, keepdims=True)
    var = jnp.mean(jnp.square(x - mean), axis=-1, keepdims=True)
    return (x - mean) * lax.rsqrt(var + LN_EPS)


def encoder_kernel(seq_ref, emb_ref, pe_ref, wlin_ref, blin_ref,
                   wxqkv_ref, bqkv_ref, wff_ref, bff_ref, o_ref):
    M = seq_ref.shape[0]                 # Bt * S rows handled this grid step
    V, E = emb_ref.shape
    S = pe_ref.shape[0]
    H = wlin_ref.shape[1]
    Bt = M // S
    d_k = H // HEADS

    # ---- embedding lookup in-kernel: exact one-hot (f32) MXU matmul ----------
    ids = seq_ref[...]                                                    # (M, 1) int32
    onehot = (lax.broadcasted_iota(jnp.int32, (M, V), 1) == ids).astype(jnp.float32)
    emb = jnp.dot(onehot, emb_ref[...],
                  preferred_element_type=jnp.float32)                     # (M, E) exact rows

    # ---- positional encoding --------------------------------------------------
    x = emb.reshape(Bt, S, E) * jnp.float32(math.sqrt(float(E))) + pe_ref[...][None]
    xb = x.reshape(M, E).astype(jnp.bfloat16)                             # bf16 MXU operand

    # ---- two independent matmuls off x (input proj + fused lin∘QKV) ----------
    h = jnp.dot(xb, wlin_ref[...],
                preferred_element_type=jnp.float32) + blin_ref[...]       # (M, H)   f32
    qkv = jnp.dot(xb, wxqkv_ref[...],
                  preferred_element_type=jnp.float32) + bqkv_ref[...]     # (M, 3H)  f32

    # ---- multi-head self-attention (no output projection in the module) ------
    inv_sqrt_dk = jnp.float32(1.0 / math.sqrt(float(d_k)))
    ctx = []
    for hh in range(HEADS):                              # 8 static iterations, Bt-batched each
        c0 = hh * d_k
        qh = qkv[:, c0:c0 + d_k].reshape(Bt, S, d_k)
        kh = qkv[:, H + c0:H + c0 + d_k].reshape(Bt, S, d_k)
        vh = qkv[:, 2 * H + c0:2 * H + c0 + d_k].reshape(Bt, S, d_k)
        s = jnp.einsum("bqd,bkd->bqk", qh, kh,
                       preferred_element_type=jnp.float32) * inv_sqrt_dk  # (Bt, S, S)
        s = s - jnp.max(s, axis=-1, keepdims=True)
        p = jnp.exp(s)
        p = p * pl.reciprocal(jnp.sum(p, axis=-1, keepdims=True), approx=True)
        c = jnp.einsum("bqk,bkd->bqd", p, vh,
                       preferred_element_type=jnp.float32)                # (Bt, S, d_k)
        ctx.append(c.reshape(M, d_k))
    attn = jnp.concatenate(ctx, axis=-1)                                  # (M, H)

    # ---- Norm: x + LayerNorm(res) ---------------------------------------------
    o1 = h + _layernorm(attn)

    # ---- FeedForward: fused single matmul (w1@w2 precomputed, no nonlinearity) -
    ff = jnp.dot(o1.astype(jnp.bfloat16), wff_ref[...],
                 preferred_element_type=jnp.float32) + bff_ref[...]       # (M, H)

    o_ref[...] = o1 + _layernorm(ff)


def make_pe(seq_len, d_model):
    # exact formula of PositionalEncoder.__init__:
    #   even col i   -> sin(pos / 10000^(2*i/d_model))
    #   odd  col i+1 -> cos(pos / 10000^(2*(i+1)/d_model))
    # i.e. every column c uses exponent 2*c/d_model; even->sin, odd->cos.
    pos = jnp.arange(seq_len, dtype=jnp.float32)[:, None]
    col = jnp.arange(d_model)
    ang = pos / jnp.power(10000.0, 2.0 * col.astype(jnp.float32) / float(d_model))
    return jnp.where(col[None, :] % 2 == 0, jnp.sin(ang), jnp.cos(ang)).astype(jnp.float32)


def _num_tensorcores():
    # v7x has 2 TensorCores per chip (megacore); v5e/v6e have 1.
    try:
        kind = jax.devices()[0].device_kind.lower()
    except Exception:
        return 1
    if "v7" in kind or "tpu7" in kind or "7x" in kind:
        return 2
    return 1


def _pick_bt(B, S, num_cores, target_rows=256):
    # Single-TC chips: grid is a serial loop -> take the whole batch in one step.
    if num_cores <= 1:
        return B
    # Multi-TC (v7x): keep >= num_cores grid steps so the "parallel" batch axis
    # feeds every core, preferring Bt that fills >= target MXU rows per step.
    cand = [bt for bt in range(1, B + 1) if B % bt == 0 and B // bt >= num_cores]
    if not cand:
        return B
    filled = [bt for bt in cand if bt * S >= target_rows]
    return max(filled) if filled else max(cand)


def prepare_params(raw):
    """One-time parameter packing (f32 algebraic fusions, bf16 weight casts).

    Call once and reuse the result; keeps per-forward glue off the hot path.
    """
    H = raw["w_lin"].shape[1]
    wqkv = jnp.concatenate([raw["wq"], raw["wk"], raw["wv"]], axis=1)          # (H, 3H) f32
    w_xqkv = raw["w_lin"].astype(jnp.float32) @ wqkv                           # (E, 3H) f32
    b_qkv = raw["b_lin"].astype(jnp.float32) @ wqkv                            # (3H,)   f32
    w_ff = raw["w1"].astype(jnp.float32) @ raw["w2"].astype(jnp.float32)       # (H, H)  f32
    b_ff = raw["b1"].astype(jnp.float32) @ raw["w2"].astype(jnp.float32) + raw["b2"]
    return dict(
        emb=raw["emb"].astype(jnp.float32),
        pe=raw["pe"].astype(jnp.float32),
        w_lin=raw["w_lin"].astype(jnp.bfloat16),
        b_lin=raw["b_lin"].reshape(1, H).astype(jnp.float32),
        w_xqkv=w_xqkv.astype(jnp.bfloat16),
        b_qkv=b_qkv.reshape(1, 3 * H).astype(jnp.float32),
        w_ff=w_ff.astype(jnp.bfloat16),
        b_ff=b_ff.reshape(1, H).astype(jnp.float32),
    )


def encoder_forward(seq, prepared, bt=None):
    B, S = seq.shape
    V, E = prepared["emb"].shape
    H = prepared["w_lin"].shape[1]
    assert prepared["pe"].shape == (S, E)
    bt = _pick_bt(B, S, _num_tensorcores()) if bt is None else bt
    assert B % bt == 0
    rows = bt * S

    seq_col = seq.reshape(B * S, 1).astype(jnp.int32)      # token ids as an int32 column

    out = pl.pallas_call(
        encoder_kernel,
        out_shape=jax.ShapeDtypeStruct((B * S, H), jnp.float32),
        grid=(B // bt,),
        in_specs=[
            pl.BlockSpec((rows, 1), lambda g: (g, 0)),      # token ids for this batch block
            pl.BlockSpec((V, E), lambda g: (0, 0)),         # frozen embedding table (f32)
            pl.BlockSpec((S, E), lambda g: (0, 0)),         # positional encoding (f32)
            pl.BlockSpec((E, H), lambda g: (0, 0)),         # input projection W (bf16)
            pl.BlockSpec((1, H), lambda g: (0, 0)),         # input projection b (f32)
            pl.BlockSpec((E, 3 * H), lambda g: (0, 0)),     # fused w_lin@[Wq|Wk|Wv] (bf16)
            pl.BlockSpec((1, 3 * H), lambda g: (0, 0)),     # fused QKV bias (f32)
            pl.BlockSpec((H, H), lambda g: (0, 0)),         # fused FF weight w1@w2 (bf16)
            pl.BlockSpec((1, H), lambda g: (0, 0)),         # fused FF bias (f32)
        ],
        out_specs=pl.BlockSpec((rows, H), lambda g: (g, 0)),
        compiler_params=pltpu.CompilerParams(
            dimension_semantics=("parallel",)),
    )(seq_col, prepared["emb"], prepared["pe"], prepared["w_lin"], prepared["b_lin"],
      prepared["w_xqkv"], prepared["b_qkv"], prepared["w_ff"], prepared["b_ff"])

    return out.reshape(B, S, H)          # free: row-major layout identical


def encoder_ref(seq, params):
    # pure-JAX reference mirroring the PyTorch forward exactly (f32)
    emb = jnp.take(params["emb"], seq, axis=0)
    B, S, E = emb.shape
    H = params["w_lin"].shape[1]
    d_k = H // HEADS
    x = emb * math.sqrt(float(E)) + params["pe"][None]
    h = x @ params["w_lin"] + params["b_lin"]
    q = (h @ params["wq"]).reshape(B, S, HEADS, d_k).transpose(0, 2, 1, 3)
    k = (h @ params["wk"]).reshape(B, S, HEADS, d_k).transpose(0, 2, 1, 3)
    v = (h @ params["wv"]).reshape(B, S, HEADS, d_k).transpose(0, 2, 1, 3)
    s = jnp.einsum("bhsd,bhtd->bhst", q, k) / math.sqrt(float(d_k))
    p = jax.nn.softmax(s, axis=-1)
    attn = jnp.einsum("bhst,bhtd->bhsd", p, v).transpose(0, 2, 1, 3).reshape(B, S, H)

    def ln(t):
        m = t.mean(-1, keepdims=True)
        vr = ((t - m) ** 2).mean(-1, keepdims=True)
        return (t - m) / jnp.sqrt(vr + LN_EPS)

    o1 = h + ln(attn)
    ff = (o1 @ params["w1"] + params["b1"]) @ params["w2"] + params["b2"]
    return o1 + ln(ff)


if __name__ == "__main__":
    B, S = 2, 8
    V, E, H, DFF = 50, 32, 64, 2048   # heads=8 -> d_k=8; d_ff=2048 (module default)

    ks = jax.random.split(jax.random.PRNGKey(0), 10)
    emb = jax.random.normal(ks[0], (V, E), jnp.float32) * 0.1
    emb = emb.at[0].set(0.0)          # padding_idx=0 row
    raw = dict(
        emb=emb,
        pe=make_pe(S, E),
        w_lin=jax.random.normal(ks[1], (E, H), jnp.float32) * 0.1,
        b_lin=jax.random.normal(ks[2], (H,), jnp.float32) * 0.1,
        wq=jax.random.normal(ks[3], (H, H), jnp.float32) * 0.1,
        wk=jax.random.normal(ks[4], (H, H), jnp.float32) * 0.1,
        wv=jax.random.normal(ks[5], (H, H), jnp.float32) * 0.1,
        w1=jax.random.normal(ks[6], (H, DFF), jnp.float32) * 0.05,
        b1=jax.random.normal(ks[7], (DFF,), jnp.float32) * 0.05,
        w2=jax.random.normal(ks[8], (DFF, H), jnp.float32) * 0.02,
        b2=jax.random.normal(ks[9], (H,), jnp.float32) * 0.02,
    )
    seq = jax.random.randint(jax.random.PRNGKey(1), (B, S), 0, V, dtype=jnp.int32)

    prepared = prepare_params(raw)        # one-time packing, reused across calls
    out = jax.block_until_ready(encoder_forward(seq, prepared))
    ref = encoder_ref(seq, raw)
    assert out.shape == (B, S, H)
    # bf16 MXU operands + approx softmax reciprocal stay well inside this tolerance
    assert jnp.allclose(out, ref, atol=2e-2, rtol=2e-2), "mismatch vs JAX reference"
    print("KERNEL_OK")
</pallas_src>

<mosaic_0001>
module attributes {stable_mosaic.version = 11 : i64} {
  func.func @encoder_kernel(%arg0: i32, %arg1: memref<16x1xi32, #tpu.memory_space<vmem>>, %arg2: memref<50x32xf32, #tpu.memory_space<vmem>>, %arg3: memref<8x32xf32, #tpu.memory_space<vmem>>, %arg4: memref<32x64xbf16, #tpu.memory_space<vmem>>, %arg5: memref<1x64xf32, #tpu.memory_space<vmem>>, %arg6: memref<32x192xbf16, #tpu.memory_space<vmem>>, %arg7: memref<1x192xf32, #tpu.memory_space<vmem>>, %arg8: memref<64x64xbf16, #tpu.memory_space<vmem>>, %arg9: memref<1x64xf32, #tpu.memory_space<vmem>>, %arg10: memref<16x64xf32, #tpu.memory_space<vmem>>) attributes {dimension_semantics = [#tpu.dimension_semantics<parallel>], iteration_bounds = array<i64: 1>, scalar_prefetch = 0 : i64, scratch_operands = 0 : i64, tpu.core_type = #tpu.core_type<tc>, window_params = [{transform_indices = @transform_0, window_bounds = array<i64: 16, 1>}, {pipeline_mode = #tpu.pipeline_mode<synchronous>, transform_indices = @transform_1, window_bounds = array<i64: 50, 32>}, {pipeline_mode = #tpu.pipeline_mode<synchronous>, transform_indices = @transform_2, window_bounds = array<i64: 8, 32>}, {pipeline_mode = #tpu.pipeline_mode<synchronous>, transform_indices = @transform_3, window_bounds = array<i64: 32, 64>}, {pipeline_mode = #tpu.pipeline_mode<synchronous>, transform_indices = @transform_4, window_bounds = array<i64: 1, 64>}, {pipeline_mode = #tpu.pipeline_mode<synchronous>, transform_indices = @transform_5, window_bounds = array<i64: 32, 192>}, {pipeline_mode = #tpu.pipeline_mode<synchronous>, transform_indices = @transform_6, window_bounds = array<i64: 1, 192>}, {pipeline_mode = #tpu.pipeline_mode<synchronous>, transform_indices = @transform_7, window_bounds = array<i64: 64, 64>}, {pipeline_mode = #tpu.pipeline_mode<synchronous>, transform_indices = @transform_8, window_bounds = array<i64: 1, 64>}, {transform_indices = @transform_9, window_bounds = array<i64: 16, 64>}]} {
    %c0 = arith.constant 0 : index
    %c0_0 = arith.constant 0 : index
    %0 = vector.load %arg1[%c0, %c0_0] : memref<16x1xi32, #tpu.memory_space<vmem>>, vector<16x1xi32>
    %1 = tpu.iota {dimensions = array<i32: 1>} : vector<16x50xi32>
    %2 = vector.broadcast %0 : vector<16x1xi32> to vector<16x50xi32>
    %3 = arith.cmpi eq, %1, %2 : vector<16x50xi32>
    %4 = arith.extui %3 : vector<16x50xi1> to vector<16x50xi32>
    %5 = arith.sitofp %4 : vector<16x50xi32> to vector<16x50xf32>
    %c0_1 = arith.constant 0 : index
    %c0_2 = arith.constant 0 : index
    %6 = vector.load %arg2[%c0_1, %c0_2] : memref<50x32xf32, #tpu.memory_space<vmem>>, vector<50x32xf32>
    %cst = arith.constant dense<0.000000e+00> : vector<16x32xf32>
    %7 = tpu.matmul %5, %6, %cst {dimension_numbers = #tpu.dot_dimension_numbers<[1], [0], [0], [1], [0, 0, 1, 1], [], []>} : vector<16x50xf32>, vector<50x32xf32>, vector<16x32xf32> -> vector<16x32xf32>
    %8 = vector.shape_cast %7 : vector<16x32xf32> to vector<2x8x32xf32>
    %cst_3 = arith.constant 5.65685415 : f32
    %9 = vector.broadcast %cst_3 : f32 to vector<2x8x32xf32>
    %10 = arith.mulf %8, %9 : vector<2x8x32xf32>
    %c0_4 = arith.constant 0 : index
    %c0_5 = arith.constant 0 : index
    %11 = vector.load %arg3[%c0_4, %c0_5] : memref<8x32xf32, #tpu.memory_space<vmem>>, vector<8x32xf32>
    %12 = vector.shape_cast %11 : vector<8x32xf32> to vector<1x8x32xf32>
    %13 = vector.broadcast %12 : vector<1x8x32xf32> to vector<2x8x32xf32>
    %14 = arith.addf %10, %13 : vector<2x8x32xf32>
    %15 = vector.shape_cast %14 : vector<2x8x32xf32> to vector<16x32xf32>
    %16 = arith.truncf %15 : vector<16x32xf32> to vector<16x32xbf16>
    %c0_6 = arith.constant 0 : index
    %c0_7 = arith.constant 0 : index
    %17 = vector.load %arg4[%c0_6, %c0_7] : memref<32x64xbf16, #tpu.memory_space<vmem>>, vector<32x64xbf16>
    %cst_8 = arith.constant dense<0.000000e+00> : vector<16x64xf32>
    %18 = tpu.matmul %16, %17, %cst_8 {dimension_numbers = #tpu.dot_dimension_numbers<[1], [0], [0], [1], [0, 0, 1, 1], [], []>} : vector<16x32xbf16>, vector<32x64xbf16>, vector<16x64xf32> -> vector<16x64xf32>
    %c0_9 = arith.constant 0 : index
    %c0_10 = arith.constant 0 : index
    %19 = vector.load %arg5[%c0_9, %c0_10] : memref<1x64xf32, #tpu.memory_space<vmem>>, vector<1x64xf32>
    %20 = vector.broadcast %19 : vector<1x64xf32> to vector<16x64xf32>
    %21 = arith.addf %18, %20 : vector<16x64xf32>
    %c0_11 = arith.constant 0 : index
    %c0_12 = arith.constant 0 : index
    %22 = vector.load %arg6[%c0_11, %c0_12] : memref<32x192xbf16, #tpu.memory_space<vmem>>, vector<32x192xbf16>
    %cst_13 = arith.constant dense<0.000000e+00> : vector<16x192xf32>
    %23 = tpu.matmul %16, %22, %cst_13 {dimension_numbers = #tpu.dot_dimension_numbers<[1], [0], [0], [1], [0, 0, 1, 1], [], []>} : vector<16x32xbf16>, vector<32x192xbf16>, vector<16x192xf32> -> vector<16x192xf32>
    %c0_14 = arith.constant 0 : index
    %c0_15 = arith.constant 0 : index
    %24 = vector.load %arg7[%c0_14, %c0_15] : memref<1x192xf32, #tpu.memory_space<vmem>>, vector<1x192xf32>
    %25 = vector.broadcast %24 : vector<1x192xf32> to vector<16x192xf32>
    %26 = arith.addf %23, %25 : vector<16x192xf32>
    %27 = vector.extract_strided_slice %26 {offsets = [0, 0], sizes = [16, 8], strides = [1, 1]} : vector<16x192xf32> to vector<16x8xf32>
    %28 = vector.shape_cast %27 : vector<16x8xf32> to vector<2x8x8xf32>
    %29 = vector.extract_strided_slice %26 {offsets = [0, 64], sizes = [16, 8], strides = [1, 1]} : vector<16x192xf32> to vector<16x8xf32>
    %30 = vector.shape_cast %29 : vector<16x8xf32> to vector<2x8x8xf32>
    %31 = vector.extract_strided_slice %26 {offsets = [0, 128], sizes = [16, 8], strides = [1, 1]} : vector<16x192xf32> to vector<16x8xf32>
    %32 = vector.shape_cast %31 : vector<16x8xf32> to vector<2x8x8xf32>
    "tpu.trace_start"() <{level = 10 : i32, message = "bqd,bkd->bqk"}> : () -> ()
    %cst_16 = arith.constant dense<0.000000e+00> : vector<2x8x8xf32>
    %33 = tpu.matmul %28, %30, %cst_16 {dimension_numbers = #tpu.dot_dimension_numbers<[2], [2], [1], [1], [0, 0, 0, 1, 1, 1], [0], [0]>} : vector<2x8x8xf32>, vector<2x8x8xf32>, vector<2x8x8xf32> -> vector<2x8x8xf32>
    "tpu.trace_stop"() : () -> ()
    %cst_17 = arith.constant 0.353553385 : f32
    %34 = vector.broadcast %cst_17 : f32 to vector<2x8x8xf32>
    %35 = arith.mulf %33, %34 : vector<2x8x8xf32>
    %cst_18 = arith.constant dense<0xFF800000> : vector<2x8xf32>
    %36 = vector.multi_reduction <maximumf>, %35, %cst_18 [2] : vector<2x8x8xf32> to vector<2x8xf32>
    %37 = vector.shape_cast %36 : vector<2x8xf32> to vector<2x8x1xf32>
    %38 = vector.broadcast %37 : vector<2x8x1xf32> to vector<2x8x8xf32>
    %39 = arith.subf %35, %38 : vector<2x8x8xf32>
    %40 = math.exp %39 : vector<2x8x8xf32>
    %cst_19 = arith.constant dense<0.000000e+00> : vector<2x8xf32>
    %41 = vector.multi_reduction <add>, %40, %cst_19 [2] : vector<2x8x8xf32> to vector<2x8xf32>
    %42 = vector.shape_cast %41 : vector<2x8xf32> to vector<2x8x1xf32>
    %43 = tpu.reciprocal %42 {approx = true} : vector<2x8x1xf32> -> vector<2x8x1xf32>
    %44 = vector.broadcast %43 : vector<2x8x1xf32> to vector<2x8x8xf32>
    %45 = arith.mulf %40, %44 : vector<2x8x8xf32>
    "tpu.trace_start"() <{level = 10 : i32, message = "bqk,bkd->bqd"}> : () -> ()
    %cst_20 = arith.constant dense<0.000000e+00> : vector<2x8x8xf32>
    %46 = tpu.matmul %45, %32, %cst_20 {dimension_numbers = #tpu.dot_dimension_numbers<[2], [1], [1], [2], [0, 0, 0, 1, 1, 2], [0], [0]>} : vector<2x8x8xf32>, vector<2x8x8xf32>, vector<2x8x8xf32> -> vector<2x8x8xf32>
    "tpu.trace_stop"() : () -> ()
    %47 = vector.shape_cast %46 : vector<2x8x8xf32> to vector<16x8xf32>
    %48 = vector.extract_strided_slice %26 {offsets = [0, 8], sizes = [16, 8], strides = [1, 1]} : vector<16x192xf32> to vector<16x8xf32>
    %49 = vector.shape_cast %48 : vector<16x8xf32> to vector<2x8x8xf32>
    %50 = vector.extract_strided_slice %26 {offsets = [0, 72], sizes = [16, 8], strides = [1, 1]} : vector<16x192xf32> to vector<16x8xf32>
    %51 = vector.shape_cast %50 : vector<16x8xf32> to vector<2x8x8xf32>
    %52 = vector.extract_strided_slice %26 {offsets = [0, 136], sizes = [16, 8], strides = [1, 1]} : vector<16x192xf32> to vector<16x8xf32>
    %53 = vector.shape_cast %52 : vector<16x8xf32> to vector<2x8x8xf32>
    "tpu.trace_start"() <{level = 10 : i32, message = "bqd,bkd->bqk"}> : () -> ()
    %cst_21 = arith.constant dense<0.000000e+00> : vector<2x8x8xf32>
    %54 = tpu.matmul %49, %51, %cst_21 {dimension_numbers = #tpu.dot_dimension_numbers<[2], [2], [1], [1], [0, 0, 0, 1, 1, 1], [0], [0]>} : vector<2x8x8xf32>, vector<2x8x8xf32>, vector<2x8x8xf32> -> vector<2x8x8xf32>
    "tpu.trace_stop"() : () -> ()
    %cst_22 = arith.constant 0.353553385 : f32
    %55 = vector.broadcast %cst_22 : f32 to vector<2x8x8xf32>
    %56 = arith.mulf %54, %55 : vector<2x8x8xf32>
    %cst_23 = arith.constant dense<0xFF800000> : vector<2x8xf32>
    %57 = vector.multi_reduction <maximumf>, %56, %cst_23 [2] : vector<2x8x8xf32> to vector<2x8xf32>
    %58 = vector.shape_cast %57 : vector<2x8xf32> to vector<2x8x1xf32>
    %59 = vector.broadcast %58 : vector<2x8x1xf32> to vector<2x8x8xf32>
    %60 = arith.subf %56, %59 : vector<2x8x8xf32>
    %61 = math.exp %60 : vector<2x8x8xf32>
    %cst_24 = arith.constant dense<0.000000e+00> : vector<2x8xf32>
    %62 = vector.multi_reduction <add>, %61, %cst_24 [2] : vector<2x8x8xf32> to vector<2x8xf32>
    %63 = vector.shape_cast %62 : vector<2x8xf32> to vector<2x8x1xf32>
    %64 = tpu.reciprocal %63 {approx = true} : vector<2x8x1xf32> -> vector<2x8x1xf32>
    %65 = vector.broadcast %64 : vector<2x8x1xf32> to vector<2x8x8xf32>
    %66 = arith.mulf %61, %65 : vector<2x8x8xf32>
    "tpu.trace_start"() <{level = 10 : i32, message = "bqk,bkd->bqd"}> : () -> ()
    %cst_25 = arith.constant dense<0.000000e+00> : vector<2x8x8xf32>
    %67 = tpu.matmul %66, %53, %cst_25 {dimension_numbers = #tpu.dot_dimension_numbers<[2], [1], [1], [2], [0, 0, 0, 1, 1, 2], [0], [0]>} : vector<2x8x8xf32>, vector<2x8x8xf32>, vector<2x8x8xf32> -> vector<2x8x8xf32>
    "tpu.trace_stop"() : () -> ()
    %68 = vector.shape_cast %67 : vector<2x8x8xf32> to vector<16x8xf32>
    %69 = vector.extract_strided_slice %26 {offsets = [0, 16], sizes = [16, 8], strides = [1, 1]} : vector<16x192xf32> to vector<16x8xf32>
    %70 = vector.shape_cast %69 : vector<16x8xf32> to vector<2x8x8xf32>
    %71 = vector.extract_strided_slice %26 {offsets = [0, 80], sizes = [16, 8], strides = [1, 1]} : vector<16x192xf32> to vector<16x8xf32>
    %72 = vector.shape_cast %71 : vector<16x8xf32> to vector<2x8x8xf32>
    %73 = vector.extract_strided_slice %26 {offsets = [0, 144], sizes = [16, 8], strides = [1, 1]} : vector<16x192xf32> to vector<16x8xf32>
    %74 = vector.shape_cast %73 : vector<16x8xf32> to vector<2x8x8xf32>
    "tpu.trace_start"() <{level = 10 : i32, message = "bqd,bkd->bqk"}> : () -> ()
    %cst_26 = arith.constant dense<0.000000e+00> : vector<2x8x8xf32>
    %75 = tpu.matmul %70, %72, %cst_26 {dimension_numbers = #tpu.dot_dimension_numbers<[2], [2], [1], [1], [0, 0, 0, 1, 1, 1], [0], [0]>} : vector<2x8x8xf32>, vector<2x8x8xf32>, vector<2x8x8xf32> -> vector<2x8x8xf32>
    "tpu.trace_stop"() : () -> ()
    %cst_27 = arith.constant 0.353553385 : f32
    %76 = vector.broadcast %cst_27 : f32 to vector<2x8x8xf32>
    %77 = arith.mulf %75, %76 : vector<2x8x8xf32>
    %cst_28 = arith.constant dense<0xFF800000> : vector<2x8xf32>
    %78 = vector.multi_reduction <maximumf>, %77, %cst_28 [2] : vector<2x8x8xf32> to vector<2x8xf32>
    %79 = vector.shape_cast %78 : vector<2x8xf32> to vector<2x8x1xf32>
    %80 = vector.broadcast %79 : vector<2x8x1xf32> to vector<2x8x8xf32>
    %81 = arith.subf %77, %80 : vector<2x8x8xf32>
    %82 = math.exp %81 : vector<2x8x8xf32>
    %cst_29 = arith.constant dense<0.000000e+00> : vector<2x8xf32>
    %83 = vector.multi_reduction <add>, %82, %cst_29 [2] : vector<2x8x8xf32> to vector<2x8xf32>
    %84 = vector.shape_cast %83 : vector<2x8xf32> to vector<2x8x1xf32>
    %85 = tpu.reciprocal %84 {approx = true} : vector<2x8x1xf32> -> vector<2x8x1xf32>
    %86 = vector.broadcast %85 : vector<2x8x1xf32> to vector<2x8x8xf32>
    %87 = arith.mulf %82, %86 : vector<2x8x8xf32>
    "tpu.trace_start"() <{level = 10 : i32, message = "bqk,bkd->bqd"}> : () -> ()
    %cst_30 = arith.constant dense<0.000000e+00> : vector<2x8x8xf32>
    %88 = tpu.matmul %87, %74, %cst_30 {dimension_numbers = #tpu.dot_dimension_numbers<[2], [1], [1], [2], [0, 0, 0, 1, 1, 2], [0], [0]>} : vector<2x8x8xf32>, vector<2x8x8xf32>, vector<2x8x8xf32> -> vector<2x8x8xf32>
    "tpu.trace_stop"() : () -> ()
    %89 = vector.shape_cast %88 : vector<2x8x8xf32> to vector<16x8xf32>
    %90 = vector.extract_strided_slice %26 {offsets = [0, 24], sizes = [16, 8], strides = [1, 1]} : vector<16x192xf32> to vector<16x8xf32>
    %91 = vector.shape_cast %90 : vector<16x8xf32> to vector<2x8x8xf32>
    %92 = vector.extract_strided_slice %26 {offsets = [0, 88], sizes = [16, 8], strides = [1, 1]} : vector<16x192xf32> to vector<16x8xf32>
    %93 = vector.shape_cast %92 : vector<16x8xf32> to vector<2x8x8xf32>
    %94 = vector.extract_strided_slice %26 {offsets = [0, 152], sizes = [16, 8], strides = [1, 1]} : vector<16x192xf32> to vector<16x8xf32>
    %95 = vector.shape_cast %94 : vector<16x8xf32> to vector<2x8x8xf32>
    "tpu.trace_start"() <{level = 10 : i32, message = "bqd,bkd->bqk"}> : () -> ()
    %cst_31 = arith.constant dense<0.000000e+00> : vector<2x8x8xf32>
    %96 = tpu.matmul %91, %93, %cst_31 {dimension_numbers = #tpu.dot_dimension_numbers<[2], [2], [1], [1], [0, 0, 0, 1, 1, 1], [0], [0]>} : vector<2x8x8xf32>, vector<2x8x8xf32>, vector<2x8x8xf32> -> vector<2x8x8xf32>
    "tpu.trace_stop"() : () -> ()
    %cst_32 = arith.constant 0.353553385 : f32
    %97 = vector.broadcast %cst_32 : f32 to vector<2x8x8xf32>
    %98 = arith.mulf %96, %97 : vector<2x8x8xf32>
    %cst_33 = arith.constant dense<0xFF800000> : vector<2x8xf32>
    %99 = vector.multi_reduction <maximumf>, %98, %cst_33 [2] : vector<2x8x8xf32> to vector<2x8xf32>
    %100 = vector.shape_cast %99 : vector<2x8xf32> to vector<2x8x1xf32>
    %101 = vector.broadcast %100 : vector<2x8x1xf32> to vector<2x8x8xf32>
    %102 = arith.subf %98, %101 : vector<2x8x8xf32>
    %103 = math.exp %102 : vector<2x8x8xf32>
    %cst_34 = arith.constant dense<0.000000e+00> : vector<2x8xf32>
    %104 = vector.multi_reduction <add>, %103, %cst_34 [2] : vector<2x8x8xf32> to vector<2x8xf32>
    %105 = vector.shape_cast %104 : vector<2x8xf32> to vector<2x8x1xf32>
    %106 = tpu.reciprocal %105 {approx = true} : vector<2x8x1xf32> -> vector<2x8x1xf32>
    %107 = vector.broadcast %106 : vector<2x8x1xf32> to vector<2x8x8xf32>
    %108 = arith.mulf %103, %107 : vector<2x8x8xf32>
    "tpu.trace_start"() <{level = 10 : i32, message = "bqk,bkd->bqd"}> : () -> ()
    %cst_35 = arith.constant dense<0.000000e+00> : vector<2x8x8xf32>
    %109 = tpu.matmul %108, %95, %cst_35 {dimension_numbers = #tpu.dot_dimension_numbers<[2], [1], [1], [2], [0, 0, 0, 1, 1, 2], [0], [0]>} : vector<2x8x8xf32>, vector<2x8x8xf32>, vector<2x8x8xf32> -> vector<2x8x8xf32>
    "tpu.trace_stop"() : () -> ()
    %110 = vector.shape_cast %109 : vector<2x8x8xf32> to vector<16x8xf32>
    %111 = vector.extract_strided_slice %26 {offsets = [0, 32], sizes = [16, 8], strides = [1, 1]} : vector<16x192xf32> to vector<16x8xf32>
    %112 = vector.shape_cast %111 : vector<16x8xf32> to vector<2x8x8xf32>
    %113 = vector.extract_strided_slice %26 {offsets = [0, 96], sizes = [16, 8], strides = [1, 1]} : vector<16x192xf32> to vector<16x8xf32>
    %114 = vector.shape_cast %113 : vector<16x8xf32> to vector<2x8x8xf32>
    %115 = vector.extract_strided_slice %26 {offsets = [0, 160], sizes = [16, 8], strides = [1, 1]} : vector<16x192xf32> to vector<16x8xf32>
    %116 = vector.shape_cast %115 : vector<16x8xf32> to vector<2x8x8xf32>
    "tpu.trace_start"() <{level = 10 : i32, message = "bqd,bkd->bqk"}> : () -> ()
    %cst_36 = arith.constant dense<0.000000e+00> : vector<2x8x8xf32>
    %117 = tpu.matmul %112, %114, %cst_36 {dimension_numbers = #tpu.dot_dimension_numbers<[2], [2], [1], [1], [0, 0, 0, 1, 1, 1], [0], [0]>} : vector<2x8x8xf32>, vector<2x8x8xf32>, vector<2x8x8xf32> -> vector<2x8x8xf32>
    "tpu.trace_stop"() : () -> ()
    %cst_37 = arith.constant 0.353553385 : f32
    %118 = vector.broadcast %cst_37 : f32 to vector<2x8x8xf32>
    %119 = arith.mulf %117, %118 : vector<2x8x8xf32>
    %cst_38 = arith.constant dense<0xFF800000> : vector<2x8xf32>
    %120 = vector.multi_reduction <maximumf>, %119, %cst_38 [2] : vector<2x8x8xf32> to vector<2x8xf32>
    %121 = vector.shape_cast %120 : vector<2x8xf32> to vector<2x8x1xf32>
    %122 = vector.broadcast %121 : vector<2x8x1xf32> to vector<2x8x8xf32>
    %123 = arith.subf %119, %122 : vector<2x8x8xf32>
    %124 = math.exp %123 : vector<2x8x8xf32>
    %cst_39 = arith.constant dense<0.000000e+00> : vector<2x8xf32>
    %125 = vector.multi_reduction <add>, %124, %cst_39 [2] : vector<2x8x8xf32> to vector<2x8xf32>
    %126 = vector.shape_cast %125 : vector<2x8xf32> to vector<2x8x1xf32>
    %127 = tpu.reciprocal %126 {approx = true} : vector<2x8x1xf32> -> vector<2x8x1xf32>
    %128 = vector.broadcast %127 : vector<2x8x1xf32> to vector<2x8x8xf32>
    %129 = arith.mulf %124, %128 : vector<2x8x8xf32>
    "tpu.trace_start"() <{level = 10 : i32, message = "bqk,bkd->bqd"}> : () -> ()
    %cst_40 = arith.constant dense<0.000000e+00> : vector<2x8x8xf32>
    %130 = tpu.matmul %129, %116, %cst_40 {dimension_numbers = #tpu.dot_dimension_numbers<[2], [1], [1], [2], [0, 0, 0, 1, 1, 2], [0], [0]>} : vector<2x8x8xf32>, vector<2x8x8xf32>, vector<2x8x8xf32> -> vector<2x8x8xf32>
    "tpu.trace_stop"() : () -> ()
    %131 = vector.shape_cast %130 : vector<2x8x8xf32> to vector<16x8xf32>
    %132 = vector.extract_strided_slice %26 {offsets = [0, 40], sizes = [16, 8], strides = [1, 1]} : vector<16x192xf32> to vector<16x8xf32>
    %133 = vector.shape_cast %132 : vector<16x8xf32> to vector<2x8x8xf32>
    %134 = vector.extract_strided_slice %26 {offsets = [0, 104], sizes = [16, 8], strides = [1, 1]} : vector<16x192xf32> to vector<16x8xf32>
    %135 = vector.shape_cast %134 : vector<16x8xf32> to vector<2x8x8xf32>
    %136 = vector.extract_strided_slice %26 {offsets = [0, 168], sizes = [16, 8], strides = [1, 1]} : vector<16x192xf32> to vector<16x8xf32>
    %137 = vector.shape_cast %136 : vector<16x8xf32> to vector<2x8x8xf32>
    "tpu.trace_start"() <{level = 10 : i32, message = "bqd,bkd->bqk"}> : () -> ()
    %cst_41 = arith.constant dense<0.000000e+00> : vector<2x8x8xf32>
    %138 = tpu.matmul %133, %135, %cst_41 {dimension_numbers = #tpu.dot_dimension_numbers<[2], [2], [1], [1], [0, 0, 0, 1, 1, 1], [0], [0]>} : vector<2x8x8xf32>, vector<2x8x8xf32>, vector<2x8x8xf32> -> vector<2x8x8xf32>
    "tpu.trace_stop"() : () -> ()
    %cst_42 = arith.constant 0.353553385 : f32
    %139 = vector.broadcast %cst_42 : f32 to vector<2x8x8xf32>
    %140 = arith.mulf %138, %139 : vector<2x8x8xf32>
    %cst_43 = arith.constant dense<0xFF800000> : vector<2x8xf32>
    %141 = vector.multi_reduction <maximumf>, %140, %cst_43 [2] : vector<2x8x8xf32> to vector<2x8xf32>
    %142 = vector.shape_cast %141 : vector<2x8xf32> to vector<2x8x1xf32>
    %143 = vector.broadcast %142 : vector<2x8x1xf32> to vector<2x8x8xf32>
    %144 = arith.subf %140, %143 : vector<2x8x8xf32>
    %145 = math.exp %144 : vector<2x8x8xf32>
    %cst_44 = arith.constant dense<0.000000e+00> : vector<2x8xf32>
    %146 = vector.multi_reduction <add>, %145, %cst_44 [2] : vector<2x8x8xf32> to vector<2x8xf32>
    %147 = vector.shape_cast %146 : vector<2x8xf32> to vector<2x8x1xf32>
    %148 = tpu.reciprocal %147 {approx = true} : vector<2x8x1xf32> -> vector<2x8x1xf32>
    %149 = vector.broadcast %148 : vector<2x8x1xf32> to vector<2x8x8xf32>
    %150 = arith.mulf %145, %149 : vector<2x8x8xf32>
    "tpu.trace_start"() <{level = 10 : i32, message = "bqk,bkd->bqd"}> : () -> ()
    %cst_45 = arith.constant dense<0.000000e+00> : vector<2x8x8xf32>
    %151 = tpu.matmul %150, %137, %cst_45 {dimension_numbers = #tpu.dot_dimension_numbers<[2], [1], [1], [2], [0, 0, 0, 1, 1, 2], [0], [0]>} : vector<2x8x8xf32>, vector<2x8x8xf32>, vector<2x8x8xf32> -> vector<2x8x8xf32>
    "tpu.trace_stop"() : () -> ()
    %152 = vector.shape_cast %151 : vector<2x8x8xf32> to vector<16x8xf32>
    %153 = vector.extract_strided_slice %26 {offsets = [0, 48], sizes = [16, 8], strides = [1, 1]} : vector<16x192xf32> to vector<16x8xf32>
    %154 = vector.shape_cast %153 : vector<16x8xf32> to vector<2x8x8xf32>
    %155 = vector.extract_strided_slice %26 {offsets = [0, 112], sizes = [16, 8], strides = [1, 1]} : vector<16x192xf32> to vector<16x8xf32>
    %156 = vector.shape_cast %155 : vector<16x8xf32> to vector<2x8x8xf32>
    %157 = vector.extract_strided_slice %26 {offsets = [0, 176], sizes = [16, 8], strides = [1, 1]} : vector<16x192xf32> to vector<16x8xf32>
    %158 = vector.shape_cast %157 : vector<16x8xf32> to vector<2x8x8xf32>
    "tpu.trace_start"() <{level = 10 : i32, message = "bqd,bkd->bqk"}> : () -> ()
    %cst_46 = arith.constant dense<0.000000e+00> : vector<2x8x8xf32>
    %159 = tpu.matmul %154, %156, %cst_46 {dimension_numbers = #tpu.dot_dimension_numbers<[2], [2], [1], [1], [0, 0, 0, 1, 1, 1], [0], [0]>} : vector<2x8x8xf32>, vector<2x8x8xf32>, vector<2x8x8xf32> -> vector<2x8x8xf32>
    "tpu.trace_stop"() : () -> ()
    %cst_47 = arith.constant 0.353553385 : f32
    %160 = vector.broadcast %cst_47 : f32 to vector<2x8x8xf32>
    %161 = arith.mulf %159, %160 : vector<2x8x8xf32>
    %cst_48 = arith.constant dense<0xFF800000> : vector<2x8xf32>
    %162 = vector.multi_reduction <maximumf>, %161, %cst_48 [2] : vector<2x8x8xf32> to vector<2x8xf32>
    %163 = vector.shape_cast %162 : vector<2x8xf32> to vector<2x8x1xf32>
    %164 = vector.broadcast %163 : vector<2x8x1xf32> to vector<2x8x8xf32>
    %165 = arith.subf %161, %164 : vector<2x8x8xf32>
    %166 = math.exp %165 : vector<2x8x8xf32>
    %cst_49 = arith.constant dense<0.000000e+00> : vector<2x8xf32>
    %167 = vector.multi_reduction <add>, %166, %cst_49 [2] : vector<2x8x8xf32> to vector<2x8xf32>
    %168 = vector.shape_cast %167 : vector<2x8xf32> to vector<2x8x1xf32>
    %169 = tpu.reciprocal %168 {approx = true} : vector<2x8x1xf32> -> vector<2x8x1xf32>
    %170 = vector.broadcast %169 : vector<2x8x1xf32> to vector<2x8x8xf32>
    %171 = arith.mulf %166, %170 : vector<2x8x8xf32>
    "tpu.trace_start"() <{level = 10 : i32, message = "bqk,bkd->bqd"}> : () -> ()
    %cst_50 = arith.constant dense<0.000000e+00> : vector<2x8x8xf32>
    %172 = tpu.matmul %171, %158, %cst_50 {dimension_numbers = #tpu.dot_dimension_numbers<[2], [1], [1], [2], [0, 0, 0, 1, 1, 2], [0], [0]>} : vector<2x8x8xf32>, vector<2x8x8xf32>, vector<2x8x8xf32> -> vector<2x8x8xf32>
    "tpu.trace_stop"() : () -> ()
    %173 = vector.shape_cast %172 : vector<2x8x8xf32> to vector<16x8xf32>
    %174 = vector.extract_strided_slice %26 {offsets = [0, 56], sizes = [16, 8], strides = [1, 1]} : vector<16x192xf32> to vector<16x8xf32>
    %175 = vector.shape_cast %174 : vector<16x8xf32> to vector<2x8x8xf32>
    %176 = vector.extract_strided_slice %26 {offsets = [0, 120], sizes = [16, 8], strides = [1, 1]} : vector<16x192xf32> to vector<16x8xf32>
    %177 = vector.shape_cast %176 : vector<16x8xf32> to vector<2x8x8xf32>
    %178 = vector.extract_strided_slice %26 {offsets = [0, 184], sizes = [16, 8], strides = [1, 1]} : vector<16x192xf32> to vector<16x8xf32>
    %179 = vector.shape_cast %178 : vector<16x8xf32> to vector<2x8x8xf32>
    "tpu.trace_start"() <{level = 10 : i32, message = "bqd,bkd->bqk"}> : () -> ()
    %cst_51 = arith.constant dense<0.000000e+00> : vector<2x8x8xf32>
    %180 = tpu.matmul %175, %177, %cst_51 {dimension_numbers = #tpu.dot_dimension_numbers<[2], [2], [1], [1], [0, 0, 0, 1, 1, 1], [0], [0]>} : vector<2x8x8xf32>, vector<2x8x8xf32>, vector<2x8x8xf32> -> vector<2x8x8xf32>
    "tpu.trace_stop"() : () -> ()
    %cst_52 = arith.constant 0.353553385 : f32
    %181 = vector.broadcast %cst_52 : f32 to vector<2x8x8xf32>
    %182 = arith.mulf %180, %181 : vector<2x8x8xf32>
    %cst_53 = arith.constant dense<0xFF800000> : vector<2x8xf32>
    %183 = vector.multi_reduction <maximumf>, %182, %cst_53 [2] : vector<2x8x8xf32> to vector<2x8xf32>
    %184 = vector.shape_cast %183 : vector<2x8xf32> to vector<2x8x1xf32>
    %185 = vector.broadcast %184 : vector<2x8x1xf32> to vector<2x8x8xf32>
    %186 = arith.subf %182, %185 : vector<2x8x8xf32>
    %187 = math.exp %186 : vector<2x8x8xf32>
    %cst_54 = arith.constant dense<0.000000e+00> : vector<2x8xf32>
    %188 = vector.multi_reduction <add>, %187, %cst_54 [2] : vector<2x8x8xf32> to vector<2x8xf32>
    %189 = vector.shape_cast %188 : vector<2x8xf32> to vector<2x8x1xf32>
    %190 = tpu.reciprocal %189 {approx = true} : vector<2x8x1xf32> -> vector<2x8x1xf32>
    %191 = vector.broadcast %190 : vector<2x8x1xf32> to vector<2x8x8xf32>
    %192 = arith.mulf %187, %191 : vector<2x8x8xf32>
    "tpu.trace_start"() <{level = 10 : i32, message = "bqk,bkd->bqd"}> : () -> ()
    %cst_55 = arith.constant dense<0.000000e+00> : vector<2x8x8xf32>
    %193 = tpu.matmul %192, %179, %cst_55 {dimension_numbers = #tpu.dot_dimension_numbers<[2], [1], [1], [2], [0, 0, 0, 1, 1, 2], [0], [0]>} : vector<2x8x8xf32>, vector<2x8x8xf32>, vector<2x8x8xf32> -> vector<2x8x8xf32>
    "tpu.trace_stop"() : () -> ()
    %194 = vector.shape_cast %193 : vector<2x8x8xf32> to vector<16x8xf32>
    %195 = tpu.concatenate %47, %68, %89, %110, %131, %152, %173, %194 in 1 : vector<16x8xf32>, vector<16x8xf32>, vector<16x8xf32>, vector<16x8xf32>, vector<16x8xf32>, vector<16x8xf32>, vector<16x8xf32>, vector<16x8xf32> -> vector<16x64xf32>
    %cst_56 = arith.constant dense<0.000000e+00> : vector<16xf32>
    %196 = vector.multi_reduction <add>, %195, %cst_56 [1] : vector<16x64xf32> to vector<16xf32>
    %197 = vector.shape_cast %196 : vector<16xf32> to vector<16x1xf32>
    %cst_57 = arith.constant 6.400000e+01 : f32
    %198 = vector.broadcast %cst_57 : f32 to vector<16x1xf32>
    %199 = arith.divf %197, %198 : vector<16x1xf32>
    %200 = vector.broadcast %199 : vector<16x1xf32> to vector<16x64xf32>
    %201 = arith.subf %195, %200 : vector<16x64xf32>
    %202 = arith.mulf %201, %201 : vector<16x64xf32>
    %cst_58 = arith.constant dense<0.000000e+00> : vector<16xf32>
    %203 = vector.multi_reduction <add>, %202, %cst_58 [1] : vector<16x64xf32> to vector<16xf32>
    %204 = vector.shape_cast %203 : vector<16xf32> to vector<16x1xf32>
    %cst_59 = arith.constant 6.400000e+01 : f32
    %205 = vector.broadcast %cst_59 : f32 to vector<16x1xf32>
    %206 = arith.divf %204, %205 : vector<16x1xf32>
    %207 = vector.broadcast %199 : vector<16x1xf32> to vector<16x64xf32>
    %208 = arith.subf %195, %207 : vector<16x64xf32>
    %cst_60 = arith.constant 9.99999974E-6 : f32
    %209 = vector.broadcast %cst_60 : f32 to vector<16x1xf32>
    %210 = arith.addf %206, %209 : vector<16x1xf32>
    %211 = math.rsqrt %210 : vector<16x1xf32>
    %212 = vector.broadcast %211 : vector<16x1xf32> to vector<16x64xf32>
    %213 = arith.mulf %208, %212 : vector<16x64xf32>
    %214 = arith.addf %21, %213 : vector<16x64xf32>
    %215 = arith.truncf %214 : vector<16x64xf32> to vector<16x64xbf16>
    %c0_61 = arith.constant 0 : index
    %c0_62 = arith.constant 0 : index
    %216 = vector.load %arg8[%c0_61, %c0_62] : memref<64x64xbf16, #tpu.memory_space<vmem>>, vector<64x64xbf16>
    %cst_63 = arith.constant dense<0.000000e+00> : vector<16x64xf32>
    %217 = tpu.matmul %215, %216, %cst_63 {dimension_numbers = #tpu.dot_dimension_numbers<[1], [0], [0], [1], [0, 0, 1, 1], [], []>} : vector<16x64xbf16>, vector<64x64xbf16>, vector<16x64xf32> -> vector<16x64xf32>
    %c0_64 = arith.constant 0 : index
    %c0_65 = arith.constant 0 : index
    %218 = vector.load %arg9[%c0_64, %c0_65] : memref<1x64xf32, #tpu.memory_space<vmem>>, vector<1x64xf32>
    %219 = vector.broadcast %218 : vector<1x64xf32> to vector<16x64xf32>
    %220 = arith.addf %217, %219 : vector<16x64xf32>
    %cst_66 = arith.constant dense<0.000000e+00> : vector<16xf32>
    %221 = vector.multi_reduction <add>, %220, %cst_66 [1] : vector<16x64xf32> to vector<16xf32>
    %222 = vector.shape_cast %221 : vector<16xf32> to vector<16x1xf32>
    %cst_67 = arith.constant 6.400000e+01 : f32
    %223 = vector.broadcast %cst_67 : f32 to vector<16x1xf32>
    %224 = arith.divf %222, %223 : vector<16x1xf32>
    %225 = vector.broadcast %224 : vector<16x1xf32> to vector<16x64xf32>
    %226 = arith.subf %220, %225 : vector<16x64xf32>
    %227 = arith.mulf %226, %226 : vector<16x64xf32>
    %cst_68 = arith.constant dense<0.000000e+00> : vector<16xf32>
    %228 = vector.multi_reduction <add>, %227, %cst_68 [1] : vector<16x64xf32> to vector<16xf32>
    %229 = vector.shape_cast %228 : vector<16xf32> to vector<16x1xf32>
    %cst_69 = arith.constant 6.400000e+01 : f32
    %230 = vector.broadcast %cst_69 : f32 to vector<16x1xf32>
    %231 = arith.divf %229, %230 : vector<16x1xf32>
    %232 = vector.broadcast %224 : vector<16x1xf32> to vector<16x64xf32>
    %233 = arith.subf %220, %232 : vector<16x64xf32>
    %cst_70 = arith.constant 9.99999974E-6 : f32
    %234 = vector.broadcast %cst_70 : f32 to vector<16x1xf32>
    %235 = arith.addf %231, %234 : vector<16x1xf32>
    %236 = math.rsqrt %235 : vector<16x1xf32>
    %237 = vector.broadcast %236 : vector<16x1xf32> to vector<16x64xf32>
    %238 = arith.mulf %233, %237 : vector<16x64xf32>
    %239 = arith.addf %214, %238 : vector<16x64xf32>
    %c0_71 = arith.constant 0 : index
    %c0_72 = arith.constant 0 : index
    %240 = vector.load %arg10[%c0_71, %c0_72] : memref<16x64xf32, #tpu.memory_space<vmem>>, vector<16x64xf32>
    tpu.vector_store %arg10[%c0_71, %c0_72], %239 {strides = array<i32>} : memref<16x64xf32, #tpu.memory_space<vmem>>, vector<16x64xf32>,
    return
  }
  func.func @transform_0(%arg0: i32) -> (i32, i32) {
    %c0_i32 = arith.constant 0 : i32
    %c0_i32_0 = arith.constant 0 : i32
    return %arg0, %c0_i32 : i32, i32
  }
  func.func @transform_1(%arg0: i32) -> (i32, i32) {
    %c0_i32 = arith.constant 0 : i32
    %c0_i32_0 = arith.constant 0 : i32
    %c0_i32_1 = arith.constant 0 : i32
    return %c0_i32, %c0_i32_0 : i32, i32
  }
  func.func @transform_2(%arg0: i32) -> (i32, i32) {
    %c0_i32 = arith.constant 0 : i32
    %c0_i32_0 = arith.constant 0 : i32
    %c0_i32_1 = arith.constant 0 : i32
    return %c0_i32, %c0_i32_0 : i32, i32
  }
  func.func @transform_3(%arg0: i32) -> (i32, i32) {
    %c0_i32 = arith.constant 0 : i32
    %c0_i32_0 = arith.constant 0 : i32
    %c0_i32_1 = arith.constant 0 : i32
    return %c0_i32, %c0_i32_0 : i32, i32
  }
  func.func @transform_4(%arg0: i32) -> (i32, i32) {
    %c0_i32 = arith.constant 0 : i32
    %c0_i32_0 = arith.constant 0 : i32
    %c0_i32_1 = arith.constant 0 : i32
    return %c0_i32, %c0_i32_0 : i32, i32
  }
  func.func @transform_5(%arg0: i32) -> (i32, i32) {
    %c0_i32 = arith.constant 0 : i32
    %c0_i32_0 = arith.constant 0 : i32
    %c0_i32_1 = arith.constant 0 : i32
    return %c0_i32, %c0_i32_0 : i32, i32
  }
  func.func @transform_6(%arg0: i32) -> (i32, i32) {
    %c0_i32 = arith.constant 0 : i32
    %c0_i32_0 = arith.constant 0 : i32
    %c0_i32_1 = arith.constant 0 : i32
    return %c0_i32, %c0_i32_0 : i32, i32
  }
  func.func @transform_7(%arg0: i32) -> (i32, i32) {
    %c0_i32 = arith.constant 0 : i32
    %c0_i32_0 = arith.constant 0 : i32
    %c0_i32_1 = arith.constant 0 : i32
    return %c0_i32, %c0_i32_0 : i32, i32
  }
  func.func @transform_8(%arg0: i32) -> (i32, i32) {
    %c0_i32 = arith.constant 0 : i32
    %c0_i32_0 = arith.constant 0 : i32
    %c0_i32_1 = arith.constant 0 : i32
    return %c0_i32, %c0_i32_0 : i32, i32
  }
  func.func @transform_9(%arg0: i32) -> (i32, i32) {
    %c0_i32 = arith.constant 0 : i32
    %c0_i32_0 = arith.constant 0 : i32
    return %arg0, %c0_i32 : i32, i32
  }
}

</mosaic_0001>

<bundles_post_ra>
// kernel: tpu_custom_call.1
= control target key start
LH: loop header
LB: loop body
LE: loop exit
PB: predicated region body
PF: predicated region fallthrough
CT: control target
= control target key end

     0   :  { %v3669_v2 = vmov 0   ;;  %s4182_s0 = inlined_call_operand.vmem [shape: s32[16,1], index: 0, kind: input, shape index: {}]   ;;  %s4183_s1 = inlined_call_operand.vmem [shape: f32[50,32], index: 1, kind: input, shape index: {}]   ;;  %s4184_s2 = inlined_call_operand.vmem [shape: f32[8,32], index: 2, kind: input, shape index: {}]   ;;  %s4185_s3 = inlined_call_operand.vmem [shape: bf16[32,64], index: 3, kind: input, shape index: {}]   ;;  %s4186_s4 = inlined_call_operand.vmem [shape: f32[1,64], index: 4, kind: input, shape index: {}]   ;;  %s4187_s5 = inlined_call_operand.vmem [shape: bf16[32,192], index: 5, kind: input, shape index: {}]   ;;  %s4188_s6 = inlined_call_operand.vmem [shape: f32[1,192], index: 6, kind: input, shape index: {}]   ;;  %s4189_s7 = inlined_call_operand.vmem [shape: bf16[64,64], index: 7, kind: input, shape index: {}]   ;;  %s4190_s8 = inlined_call_operand.vmem [shape: f32[1,64], index: 8, kind: input, shape index: {}]   ;;  %s4191_s9 = inlined_call_operand.hbm [shape: f32[16,64], index: 9, kind: output, shape index: {}]  }
   0x1   :  { %v34_v0 = vld [vmem:[%s4182_s0] sm:$0xff]  ;;  %3560 = vset.pattern.permute.xlu0 %v3669_v2  ;;  %v35_v3 = vld [vmem:[%s4182_s0 + $0x8] sm:$0xff]  ;;  %v52_v5 = vld [vmem:[%s4183_s1 + $0x10] sm:$0xff]  ;;  %285 = vmatprep.mubr.bf16.mxu1 %v3669_v2 }
   0x2   :  { %v50_v1 = vld [vmem:[%s4183_s1] sm:$0xff]  ;;  %v51_v4 = vld [vmem:[%s4183_s1 + $0x8] sm:$0xff]  ;;  %v53_v6 = vld [vmem:[%s4183_s1 + $0x18] sm:$0xff]  ;;  %39 = vperm.xlu0 %3560, %v34_v0  }
   0x3   :  { %v3528_v7 = vpack.c.bf16 %v51_v4, %v50_v1  ;;  %v3532_v8 = vpack.c.bf16 %v53_v6, %v52_v5  ;;  %v54_v9 = vld [vmem:[%s4183_s1 + $0x20] sm:$0xff]  ;;  %v55_v10 = vld [vmem:[%s4183_s1 + $0x28] sm:$0xff] }
   0x4   :  { %v3536_v11 = vpack.c.bf16 %v55_v10, %v54_v9 }
   0x5   :  { %3529 = vmatprep.subr.bf16.mxu0 %v3528_v7 }
   0x6   :  { %3531 = vmatpush3.bf16.msra.mxu0 %v3528_v7  ;;  %42 = vperm.xlu0 %3560, %v35_v3  }
   0x7   :  { %3533 = vmatprep.subr.bf16.mxu0 %v3532_v8 }
   0x8   :  { %14 = vsyncpa [#allocation3], 0  ;;  %v56_v12 = vld [vmem:[%s4183_s1 + $0x30] sm:$0x3]  ;;  %vm64_vm0 = vcmask 1041408   ;;  %v3670_v13 = vmov 0.0   ;;  %v36_v14 = vlaneseq }
   0x9   :  { %vm57_vm1 = vcmask 408576   ;;  %v3561_v20 = vld [vmem:[%s4187_s5 + $0x4] ss:$8 sps:$4 sm:$0xff]   ;;  %v3564_v22 = vld [vmem:[%s4187_s5] ss:$8 sps:$4 sm:$0xff]   ;;  %vm3671_vm4 = vmmov 0  }
   0xa   :  { %3535 = vmatpush3.bf16.msra.mxu0 %v3532_v8  ;;  %v37_v15 = vand.u32 127, %v36_v14  ;;  %v3563_v21 = vld [vmem:[%s4185_s3] sm:$0xff]   ;;  %253 = vmatprep.subr.bf16.mxu1 %v3561_v20  ;;  %v3565_v23 = vld [vmem:[%s4187_s5 + $0x14] ss:$8 sps:$4 sm:$0xff]   ;;  %v3567_v24 = vld [vmem:[%s4185_s3 + $0x8] sm:$0xff]   ;;  %vm172_vm5 = vcmask 261120  }
   0xb   :  { %3537 = vmatprep.subr.bf16.mxu0 %v3536_v11  ;;  %254 = vmatpush1.bf16.msra.mxu1 %v3564_v22  ;;  %v3568_v25 = vld [vmem:[%s4187_s5 + $0x10] ss:$8 sps:$4 sm:$0xff]   ;;  %v145_v27 = vld [vmem:[%s4184_s2] sm:$0xff]  ;;  %v224_v34 = vshrl.u32 %v36_v14, 7  ;;  %s3672_s5 = smov 64   ;;  %vm299_vm6 = vcmask 64512  }
   0xc   :  { %255 = vmatprep.subr.bf16.mxu1 %v3565_v23  ;;  %v221_v36 = vld [vmem:[%s4188_s6] sm:$0x3]  ;;  %s3673_s6 = smov 56   ;;  %s3674_s18 = smov 120   ;;  %vm3005_vm7 = vcmask 130048   ;;  %vm3008_vm8 = vcmask 195584  }
   0xd   :  { %v225_v35 = vsub.s32 0, %v224_v34  ;;  %v229_v37 = vsub.s32 1, %v224_v34  ;;  %s3675_s19 = smov 48   ;;  %s3676_s20 = smov 112   ;;  %vm3013_vm9 = vcmask 326656   ;;  %vm3019_vm10 = vcmask 457728  }
   0xe   :  { %3539 = vmatpush3.bf16.msra.mxu0 %v3536_v11  ;;  %s3677_s21 = smov 40   ;;  %s3678_s22 = smov 104   ;;  %vm3016_vm11 = vcmask 392192   ;;  %vm3022_vm12 = vcmask 523264  }
   0xf   :  { %3343 = vmatprep.subr.msk.mxu0 %vm64_vm0, %v56_v12  ;;  %256 = vmatpush1.bf16.msra.mxu1 %v3568_v25  ;;  %v226_v38 = vrot.slane %v221_v36, %v225_v35  ;;  %v230_v39 = vrot.slane %v221_v36, %v229_v37  ;;  %s3679_s0 = smov 32   ;;  %s3680_s23 = smov 96  }
  0x10   :  { %3366 = vmatprep.subr.mxu1 %v3670_v13  ;;  %s3681_s24 = smov 24   ;;  %s3682_s25 = smov 88  }
  0x11   :  { %s3683_s1 = smov 16   ;;  %s3684_s26 = smov 80  }
  0x12   :  { %3344 = vmatpush3.msk.msra.mxu0 %vm64_vm0, %v56_v12  ;;  %s3685_s27 = smov 8   ;;  %s3686_s28 = smov 72  }
  0x13   :  { %3348 = vmatprep.subr.bf16.mxu0 %v3670_v13 }
  0x81   :  { %v40_v16 = vpop.permute.xlu0 %39 }
  0x82   :  { %vm44_vm2 = vcmp.eq.s32.totalorder %v37_v15, %v40_v16 }
  0x83   :  { %v3182_v17 = vsel %vm44_vm2, 1.0, %v3670_v13 }
  0x84   :  { %3345 = vmatprep.mubr.msk.f32.mxu0 %vm57_vm1, %v3182_v17 }
  0x85   :  { %v43_v18 = vpop.permute.xlu0 %42 }
  0x86   :  { %vm45_vm3 = vcmp.eq.s32.totalorder %v37_v15, %v43_v18 }
  0x87   :  { %v3183_v19 = vsel %vm45_vm3, 1.0, %v3670_v13 }
  0x88   :  { %3346 = vmatmul.mubr.msk.f32.vlgmr.msra.gmra.mrb[0].mxu0 %vm57_vm1, %v3183_v19 }
  0x89   :  { %3349 = vmatpush3.bf16.msra.mxu0 %v3563_v21  ;;  %3352 = vmatprep.mubr.msk.bf16.mxu0 %vm3671_vm4, %v3670_v13 }
  0x8a   :  { %3350 = vmatprep.subr.bf16.mxu0 %v3670_v13 }
  0x8d   :  { %3351 = vmatpush3.bf16.msra.mxu0 %v3567_v24 }
  0x8e   :  { %3356 = vmatprep.subr.mxu0 %v3670_v13 }
 0x15b   :  { %v3347_v26 = vpop.f32.mrb[0].mxu0 }
 0x15c   :  { %v144_v28 = vmul.f32 5.656854, %v3347_v26  ;;  %v134_v29 = vpop.f32.mrb[1].mxu0 }
 0x15d   :  { %v143_v30 = vmul.f32 5.656854, %v134_v29 }
 0x15e   :  { %v147_v31 = vadd.f32 %v145_v27, %v144_v28 }
 0x15f   :  { %v146_v32 = vadd.f32 %v145_v27, %v143_v30 }
 0x161   :  { %v148_v33 = vpack.c.bf16 %v147_v31, %v146_v32 }
 0x163   :  { %3353 = vmatmul.mubr.msk.bf16.vlgmr.msra.gmra.mrb[4].mxu0 %vm172_vm5, %v148_v33  ;;  %3195 = vmatmul.mubr.msk.bf16.vlgmr.msra.gmra.mrb[0].mxu1 %vm172_vm5, %v148_v33 }
 0x164   :  { %3358 = vmatprep.mubr.msk.f32.mxu0 %vm3671_vm4, %v3670_v13  ;;  %3368 = vmatprep.mubr.msk.f32.mxu1 %vm3671_vm4, %v3670_v13 }
 0x236   :  { %v3804_v40 = vpop.f32.mrb[4].mxu0  ;;  %v287_v41 = vpop.f32.mrb[0].mxu1 }
 0x237   :  { %v3806_v42 = vadd.f32 %v287_v41, %v226_v38  ;;  %v3354_v43 = vpop.f32.mrb[5].mxu0  ;;  %v289_v44 = vpop.f32.mrb[1].mxu1 }
 0x238   :  { %v3808_v45 = vadd.f32 %v289_v44, %v230_v39  ;;  %v3810_v46 = vpop.f32.mrb[6].mxu0  ;;  %v291_v47 = vpop.f32.mrb[2].mxu1 }
 0x239   :  { %v293_v48 = vpop.f32.mrb[3].mxu1  ;;  %297 = vrot.lane.b32.xlu1 %v3806_v42, %s3672_s5  ;;  %v3355_v49 = vpop.f32.mrb[7].mxu0  ;;  %v3816_v51 = vadd.f32 %v291_v47, %v226_v38 }
 0x23a   :  { %v3813_v50 = vadd.f32 %v293_v48, %v230_v39  ;;  %3367 = vmatpush3.msra.mxu1 %v3808_v45 }
 0x23b   :  { %3376 = vmatprep.subr.mxu1 %v3670_v13 }
 0x23d   :  { %375 = vrot.lane.b32.xlu1 %v3816_v51, %s3672_s5 }
 0x2ab   :  { %v298_v52 = vpop.permute.xlu1 %297 }
 0x2ac   :  { %3357 = vmatpush3.xpose.msk.msra.mxu0 %vm299_vm6, %v298_v52 }
 0x2ad   :  { %3361 = vmatprep.subr.mxu0 %v3670_v13 }
 0x2af   :  { %v376_v53 = vpop.permute.xlu1 %375  ;;  %3359 = vmatmul.mubr.msk.f32.vlgmr.msra.gmra.mrb[2].mxu0 %vm299_vm6, %v3806_v42 }
 0x2b0   :  { %3362 = vmatpush3.xpose.msk.msra.mxu0 %vm299_vm6, %v376_v53  ;;  %3363 = vmatprep.mubr.msk.f32.mxu0 %vm3671_vm4, %v3670_v13 }
 0x2b1   :  { %3371 = vmatprep.subr.mxu0 %v3670_v13 }
 0x2b3   :  { %3364 = vmatmul.mubr.msk.f32.vlgmr.msra.gmra.mrb[8].mxu0 %vm299_vm6, %v3816_v51 }
 0x2b4   :  { %3372 = vmatpush3.msra.mxu0 %v3813_v50  ;;  %3373 = vmatprep.mubr.msk.f32.mxu0 %vm3671_vm4, %v3670_v13 }
 0x2b5   :  { %3381 = vmatprep.subr.mxu0 %v3670_v13 }
 0x382   :  { %v370_v54 = vpop.f32.mrb[2].mxu0 }
 0x383   :  { %v451_v55 = vmul.f32 0.35355338, %v370_v54  ;;  %v3360_v56 = vpop.f32.mrb[3].mxu0 }
 0x385   :  { %v453_v57 = vsel %vm299_vm6, %v451_v55, -inf }
 0x386   :  { %454 = vmax.xlane.f32.xlu0 %v453_v57  ;;  %v447_v58 = vpop.f32.mrb[8].mxu0 }
 0x387   :  { %v452_v59 = vmul.f32 0.35355338, %v447_v58  ;;  %v3365_v60 = vpop.f32.mrb[9].mxu0 }
 0x389   :  { %v456_v61 = vsel %vm299_vm6, %v452_v59, -inf }
 0x38a   :  { %457 = vmax.xlane.f32.xlu1 %v456_v61 }
 0x39b   :  { %623 = vrot.lane.b32.xlu1 %v3806_v42, %s3673_s6 }
 0x39f   :  { %621 = vrot.lane.b32.xlu1 %v3806_v42, %s3674_s18 }
 0x3a3   :  { %699 = vrot.lane.b32.xlu1 %v3816_v51, %s3674_s18 }
 0x413   :  { %v455_v62 = vpop.xlane.xlu0 %454 }
 0x414   :  { %v459_v63 = vsub.f32 %v451_v55, %v455_v62 }
 0x416   :  { %v461_v0 = vmul.f32 1.442695, %v459_v63 }
 0x417   :  { %v458_v1 = vpop.xlane.xlu1 %457 }
 0x418   :  { %3573 = vpow2.f32 %v461_v0  ;;  %v460_v2 = vsub.f32 %v452_v59, %v458_v1 }
 0x41a   :  { %v463_v3 = vmul.f32 1.442695, %v460_v2 }
 0x41b   :  { %v624_v10 = vpop.permute.xlu1 %623 }
 0x41c   :  { %3575 = vpow2.f32 %v463_v3 }
 0x41f   :  { %v622_v15 = vpop.permute.xlu1 %621 }
 0x422   :  { %v3574_v4 = vpop.eup %3573 }
 0x423   :  { %v465_v5 = vsel %vm299_vm6, %v3574_v4, 0.0  ;;  %v700_v18 = vpop.permute.xlu1 %699 }
 0x424   :  { %466 = vadd.xlane.f32.xlu0 %v465_v5 }
 0x426   :  { %v3576_v6 = vpop.eup %3575 }
 0x427   :  { %v468_v7 = vsel %vm299_vm6, %v3576_v6, 0.0 }
 0x428   :  { %469 = vadd.xlane.f32.xlu0 %v468_v7 }
 0x43e   :  { %701 = vrot.lane.b32.xlu0 %v3816_v51, %s3673_s6 }
 0x4b1   :  { %v467_v8 = vpop.xlane.xlu0 %466 }
 0x4b2   :  { %3577 = vrcp.f32 %v467_v8 }
 0x4b5   :  { %v470_v9 = vpop.xlane.xlu0 %469 }
 0x4b6   :  { %3579 = vrcp.f32 %v470_v9 }
 0x4b9   :  { %v702_v17 = vpop.permute.xlu0 %701 }
 0x4bc   :  { %v3578_v11 = vpop.eup %3577 }
 0x4bd   :  { %v473_v12 = vmul.f32 %v3578_v11, %v3574_v4 }
 0x4bf   :  { %3369 = vmatmul.mubr.msk.f32.vlgmr.msra.gmra.mrb[4].mxu1 %vm299_vm6, %v473_v12 }
 0x4c0   :  { %v3580_v14 = vpop.eup %3579  ;;  %3377 = vmatpush3.xpose.msk.msra.mxu1 %vm299_vm6, %v624_v10  ;;  %3378 = vmatprep.mubr.msk.f32.mxu1 %vm3671_vm4, %v3670_v13 }
 0x4c1   :  { %v474_v16 = vmul.f32 %v3580_v14, %v3576_v6  ;;  %3386 = vmatprep.subr.mxu1 %v3670_v13 }
 0x4c3   :  { %3374 = vmatmul.mubr.msk.f32.vlgmr.msra.gmra.mrb[10].mxu0 %vm299_vm6, %v474_v16  ;;  %3379 = vmatmul.mubr.msk.f32.vlgmr.msra.gmra.mrb[6].mxu1 %vm299_vm6, %v622_v15 }
 0x4c4   :  { %3382 = vmatpush3.xpose.msk.msra.mxu0 %vm299_vm6, %v702_v17  ;;  %3383 = vmatprep.mubr.msk.f32.mxu0 %vm3671_vm4, %v3670_v13 }
 0x4c5   :  { %3391 = vmatprep.subr.mxu0 %v3670_v13  ;;  %3388 = vmatprep.mubr.msk.f32.mxu1 %vm3671_vm4, %v3670_v13 }
 0x4c7   :  { %3384 = vmatmul.mubr.msk.f32.vlgmr.msra.gmra.mrb[12].mxu0 %vm299_vm6, %v700_v18 }
 0x4c8   :  { %3393 = vmatprep.mubr.msk.f32.mxu0 %vm3671_vm4, %v3670_v13 }
 0x592   :  { %v3862_v19 = vpop.f32.mrb[4].mxu1 }
 0x593   :  { %v3370_v20 = vpop.f32.mrb[5].mxu1 }
 0x596   :  { %v3864_v21 = vpop.f32.mrb[10].mxu0  ;;  %v695_v22 = vpop.f32.mrb[6].mxu1 }
 0x597   :  { %v777_v23 = vmul.f32 0.35355338, %v695_v22  ;;  %v3375_v24 = vpop.f32.mrb[11].mxu0  ;;  %v3380_v25 = vpop.f32.mrb[7].mxu1 }
 0x599   :  { %v779_v26 = vsel %vm299_vm6, %v777_v23, -inf }
 0x59a   :  { %780 = vmax.xlane.f32.xlu0 %v779_v26  ;;  %v773_v27 = vpop.f32.mrb[12].mxu0 }
 0x59b   :  { %v778_v28 = vmul.f32 0.35355338, %v773_v27  ;;  %v3385_v29 = vpop.f32.mrb[13].mxu0 }
 0x59d   :  { %v782_v30 = vsel %vm299_vm6, %v778_v28, -inf }
 0x59e   :  { %783 = vmax.xlane.f32.xlu1 %v782_v30 }
 0x5af   :  { %802 = vrot.lane.b32.xlu1 %v3808_v45, %s3674_s18 }
 0x5b0   :  { %879 = vrot.lane.b32.xlu0 %v3813_v50, %s3674_s18 }
 0x5b3   :  { %957 = vrot.lane.b32.xlu1 %v3806_v42, %s3675_s19 }
 0x5b7   :  { %1035 = vrot.lane.b32.xlu1 %v3816_v51, %s3675_s19 }
 0x5bb   :  { %1033 = vrot.lane.b32.xlu1 %v3816_v51, %s3676_s20 }
 0x627   :  { %v781_v31 = vpop.xlane.xlu0 %780 }
 0x628   :  { %v785_v32 = vsub.f32 %v777_v23, %v781_v31 }
 0x62a   :  { %v787_v33 = vmul.f32 1.442695, %v785_v32 }
 0x62b   :  { %v880_v34 = vpop.permute.xlu0 %879  ;;  %v784_v35 = vpop.xlane.xlu1 %783 }
 0x62c   :  { %3581 = vpow2.f32 %v787_v33  ;;  %v786_v36 = vsub.f32 %v778_v28, %v784_v35  ;;  %3392 = vmatpush3.msra.mxu0 %v880_v34 }
 0x62d   :  { %3401 = vmatprep.subr.mxu0 %v3670_v13 }
 0x62e   :  { %v789_v37 = vmul.f32 1.442695, %v786_v36 }
 0x62f   :  { %v803_v38 = vpop.permute.xlu1 %802 }
 0x630   :  { %3583 = vpow2.f32 %v789_v37  ;;  %3387 = vmatpush3.msra.mxu1 %v803_v38 }
 0x631   :  { %3396 = vmatprep.subr.mxu1 %v3670_v13 }
 0x633   :  { %v958_v49 = vpop.permute.xlu1 %957 }
 0x636   :  { %v3582_v39 = vpop.eup %3581 }
 0x637   :  { %v791_v41 = vsel %vm299_vm6, %v3582_v39, 0.0  ;;  %v1036_v55 = vpop.permute.xlu1 %1035 }
 0x638   :  { %792 = vadd.xlane.f32.xlu0 %v791_v41 }
 0x63a   :  { %v3584_v43 = vpop.eup %3583 }
 0x63b   :  { %v794_v44 = vsel %vm299_vm6, %v3584_v43, 0.0  ;;  %v1034_v58 = vpop.permute.xlu1 %1033 }
 0x63c   :  { %795 = vadd.xlane.f32.xlu0 %v794_v44 }
 0x652   :  { %955 = vrot.lane.b32.xlu0 %v3806_v42, %s3676_s20 }
 0x6c5   :  { %v793_v47 = vpop.xlane.xlu0 %792 }
 0x6c6   :  { %3585 = vrcp.f32 %v793_v47 }
 0x6c9   :  { %v796_v48 = vpop.xlane.xlu0 %795 }
 0x6ca   :  { %3587 = vrcp.f32 %v796_v48 }
 0x6cd   :  { %v956_v57 = vpop.permute.xlu0 %955 }
 0x6d0   :  { %v3586_v52 = vpop.eup %3585 }
 0x6d1   :  { %v799_v53 = vmul.f32 %v3586_v52, %v3582_v39 }
 0x6d3   :  { %3389 = vmatmul.mubr.msk.f32.vlgmr.msra.gmra.mrb[8].mxu1 %vm299_vm6, %v799_v53 }
 0x6d4   :  { %v3588_v54 = vpop.eup %3587  ;;  %3397 = vmatpush3.xpose.msk.msra.mxu1 %vm299_vm6, %v958_v49  ;;  %3398 = vmatprep.mubr.msk.f32.mxu1 %vm3671_vm4, %v3670_v13 }
 0x6d5   :  { %v800_v56 = vmul.f32 %v3588_v54, %v3584_v43  ;;  %3406 = vmatprep.subr.mxu1 %v3670_v13 }
 0x6d7   :  { %3394 = vmatmul.mubr.msk.f32.vlgmr.msra.gmra.mrb[14].mxu0 %vm299_vm6, %v800_v56  ;;  %3399 = vmatmul.mubr.msk.f32.vlgmr.msra.gmra.mrb[10].mxu1 %vm299_vm6, %v956_v57 }
 0x6d8   :  { %3402 = vmatpush3.xpose.msk.msra.mxu0 %vm299_vm6, %v1036_v55  ;;  %3403 = vmatprep.mubr.msk.f32.mxu0 %vm3671_vm4, %v3670_v13 }
 0x6d9   :  { %3411 = vmatprep.subr.mxu0 %v3670_v13  ;;  %3408 = vmatprep.mubr.msk.f32.mxu1 %vm3671_vm4, %v3670_v13 }
 0x6db   :  { %3404 = vmatmul.mubr.msk.f32.vlgmr.msra.gmra.mrb[16].mxu0 %vm299_vm6, %v1034_v58 }
 0x6dc   :  { %3413 = vmatprep.mubr.msk.f32.mxu0 %vm3671_vm4, %v3670_v13 }
 0x7a6   :  { %v3900_v59 = vpop.f32.mrb[8].mxu1 }
 0x7a7   :  { %v3390_v60 = vpop.f32.mrb[9].mxu1 }
 0x7aa   :  { %v3902_v61 = vpop.f32.mrb[14].mxu0  ;;  %v1029_v62 = vpop.f32.mrb[10].mxu1 }
 0x7ab   :  { %v1111_v63 = vmul.f32 0.35355338, %v1029_v62  ;;  %v3395_v0 = vpop.f32.mrb[15].mxu0  ;;  %v3400_v1 = vpop.f32.mrb[11].mxu1 }
 0x7ad   :  { %v1113_v2 = vsel %vm299_vm6, %v1111_v63, -inf }
 0x7ae   :  { %1114 = vmax.xlane.f32.xlu0 %v1113_v2  ;;  %v1107_v3 = vpop.f32.mrb[16].mxu0 }
 0x7af   :  { %v1112_v4 = vmul.f32 0.35355338, %v1107_v3  ;;  %v3405_v5 = vpop.f32.mrb[17].mxu0 }
 0x7b1   :  { %v1116_v6 = vsel %vm299_vm6, %v1112_v4, -inf }
 0x7b2   :  { %1117 = vmax.xlane.f32.xlu1 %v1116_v6 }
 0x7c3   :  { %1135 = vrot.lane.b32.xlu1 %v3808_v45, %s3676_s20 }
 0x7c4   :  { %1211 = vrot.lane.b32.xlu0 %v3813_v50, %s3676_s20 }
 0x7c7   :  { %1289 = vrot.lane.b32.xlu1 %v3806_v42, %s3677_s21 }
 0x7cb   :  { %1367 = vrot.lane.b32.xlu1 %v3816_v51, %s3677_s21 }
 0x7cf   :  { %1365 = vrot.lane.b32.xlu1 %v3816_v51, %s3678_s22 }
 0x83b   :  { %v1115_v7 = vpop.xlane.xlu0 %1114 }
 0x83c   :  { %v1119_v8 = vsub.f32 %v1111_v63, %v1115_v7 }
 0x83e   :  { %v1121_v9 = vmul.f32 1.442695, %v1119_v8 }
 0x83f   :  { %v1212_v10 = vpop.permute.xlu0 %1211  ;;  %v1118_v11 = vpop.xlane.xlu1 %1117 }
 0x840   :  { %3589 = vpow2.f32 %v1121_v9  ;;  %v1120_v12 = vsub.f32 %v1112_v4, %v1118_v11  ;;  %3412 = vmatpush3.msra.mxu0 %v1212_v10 }
 0x841   :  { %3421 = vmatprep.subr.mxu0 %v3670_v13 }
 0x842   :  { %v1123_v14 = vmul.f32 1.442695, %v1120_v12 }
 0x843   :  { %v1136_v15 = vpop.permute.xlu1 %1135 }
 0x844   :  { %3591 = vpow2.f32 %v1123_v14  ;;  %3407 = vmatpush3.msra.mxu1 %v1136_v15 }
 0x845   :  { %3416 = vmatprep.subr.mxu1 %v3670_v13 }
 0x847   :  { %v1290_v24 = vpop.permute.xlu1 %1289 }
 0x84a   :  { %v3590_v16 = vpop.eup %3589 }
 0x84b   :  { %v1125_v17 = vsel %vm299_vm6, %v3590_v16, 0.0  ;;  %v1368_v28 = vpop.permute.xlu1 %1367 }
 0x84c   :  { %1126 = vadd.xlane.f32.xlu0 %v1125_v17 }
 0x84e   :  { %v3592_v18 = vpop.eup %3591 }
 0x84f   :  { %v1128_v20 = vsel %vm299_vm6, %v3592_v18, 0.0  ;;  %v1366_v31 = vpop.permute.xlu1 %1365 }
 0x850   :  { %1129 = vadd.xlane.f32.xlu0 %v1128_v20 }
 0x866   :  { %1287 = vrot.lane.b32.xlu0 %v3806_v42, %s3678_s22 }
 0x8d9   :  { %v1127_v22 = vpop.xlane.xlu0 %1126 }
 0x8da   :  { %3593 = vrcp.f32 %v1127_v22 }
 0x8dd   :  { %v1130_v23 = vpop.xlane.xlu0 %1129 }
 0x8de   :  { %3595 = vrcp.f32 %v1130_v23 }
 0x8e1   :  { %v1288_v30 = vpop.permute.xlu0 %1287 }
 0x8e4   :  { %v3594_v25 = vpop.eup %3593 }
 0x8e5   :  { %v1133_v26 = vmul.f32 %v3594_v25, %v3590_v16 }
 0x8e7   :  { %3409 = vmatmul.mubr.msk.f32.vlgmr.msra.gmra.mrb[12].mxu1 %vm299_vm6, %v1133_v26 }
 0x8e8   :  { %v3596_v27 = vpop.eup %3595  ;;  %3417 = vmatpush3.xpose.msk.msra.mxu1 %vm299_vm6, %v1290_v24  ;;  %3418 = vmatprep.mubr.msk.f32.mxu1 %vm3671_vm4, %v3670_v13 }
 0x8e9   :  { %v1134_v29 = vmul.f32 %v3596_v27, %v3592_v18  ;;  %3426 = vmatprep.subr.mxu1 %v3670_v13 }
 0x8eb   :  { %3414 = vmatmul.mubr.msk.f32.vlgmr.msra.gmra.mrb[18].mxu0 %vm299_vm6, %v1134_v29  ;;  %3419 = vmatmul.mubr.msk.f32.vlgmr.msra.gmra.mrb[14].mxu1 %vm299_vm6, %v1288_v30 }
 0x8ec   :  { %3422 = vmatpush3.xpose.msk.msra.mxu0 %vm299_vm6, %v1368_v28  ;;  %3423 = vmatprep.mubr.msk.f32.mxu0 %vm3671_vm4, %v3670_v13 }
 0x8ed   :  { %3431 = vmatprep.subr.mxu0 %v3670_v13  ;;  %3428 = vmatprep.mubr.msk.f32.mxu1 %vm3671_vm4, %v3670_v13 }
 0x8ef   :  { %3424 = vmatmul.mubr.msk.f32.vlgmr.msra.gmra.mrb[20].mxu0 %vm299_vm6, %v1366_v31 }
 0x8f0   :  { %3433 = vmatprep.mubr.msk.f32.mxu0 %vm3671_vm4, %v3670_v13 }
 0x9ba   :  { %v3938_v32 = vpop.f32.mrb[12].mxu1 }
 0x9bb   :  { %v3410_v33 = vpop.f32.mrb[13].mxu1 }
 0x9be   :  { %v3940_v34 = vpop.f32.mrb[18].mxu0  ;;  %v1361_v35 = vpop.f32.mrb[14].mxu1 }
 0x9bf   :  { %v1443_v36 = vmul.f32 0.35355338, %v1361_v35  ;;  %v3415_v37 = vpop.f32.mrb[19].mxu0  ;;  %v3420_v38 = vpop.f32.mrb[15].mxu1 }
 0x9c1   :  { %v1445_v39 = vsel %vm299_vm6, %v1443_v36, -inf }
 0x9c2   :  { %1446 = vmax.xlane.f32.xlu0 %v1445_v39  ;;  %v1439_v41 = vpop.f32.mrb[20].mxu0 }
 0x9c3   :  { %v1444_v43 = vmul.f32 0.35355338, %v1439_v41  ;;  %v3425_v44 = vpop.f32.mrb[21].mxu0 }
 0x9c5   :  { %v1448_v47 = vsel %vm299_vm6, %v1444_v43, -inf }
 0x9c6   :  { %1449 = vmax.xlane.f32.xlu1 %v1448_v47 }
 0x9d7   :  { %1467 = vrot.lane.b32.xlu1 %v3808_v45, %s3678_s22 }
 0x9d8   :  { %1543 = vrot.lane.b32.xlu0 %v3813_v50, %s3678_s22 }
 0x9db   :  { %1621 = vrot.lane.b32.xlu1 %v3806_v42, %s3679_s0 }
 0x9df   :  { %1699 = vrot.lane.b32.xlu1 %v3816_v51, %s3679_s0 }
 0x9e3   :  { %1697 = vrot.lane.b32.xlu1 %v3816_v51, %s3680_s23 }
 0xa4f   :  { %v1447_v48 = vpop.xlane.xlu0 %1446 }
 0xa50   :  { %v1451_v49 = vsub.f32 %v1443_v36, %v1447_v48 }
 0xa52   :  { %v1453_v52 = vmul.f32 1.442695, %v1451_v49 }
 0xa53   :  { %v1544_v53 = vpop.permute.xlu0 %1543  ;;  %v1450_v54 = vpop.xlane.xlu1 %1449 }
 0xa54   :  { %3597 = vpow2.f32 %v1453_v52  ;;  %v1452_v55 = vsub.f32 %v1444_v43, %v1450_v54  ;;  %3432 = vmatpush3.msra.mxu0 %v1544_v53 }
 0xa55   :  { %3441 = vmatprep.subr.mxu0 %v3670_v13 }
 0xa56   :  { %v1455_v56 = vmul.f32 1.442695, %v1452_v55 }
 0xa57   :  { %v1468_v57 = vpop.permute.xlu1 %1467 }
 0xa58   :  { %3599 = vpow2.f32 %v1455_v56  ;;  %3427 = vmatpush3.msra.mxu1 %v1468_v57 }
 0xa59   :  { %3436 = vmatprep.subr.mxu1 %v3670_v13 }
 0xa5b   :  { %v1622_v2 = vpop.permute.xlu1 %1621 }
 0xa5e   :  { %v3598_v58 = vpop.eup %3597 }
 0xa5f   :  { %v1457_v60 = vsel %vm299_vm6, %v3598_v58, 0.0  ;;  %v1700_v6 = vpop.permute.xlu1 %1699 }
 0xa60   :  { %1458 = vadd.xlane.f32.xlu0 %v1457_v60 }
 0xa62   :  { %v3600_v62 = vpop.eup %3599 }
 0xa63   :  { %v1460_v63 = vsel %vm299_vm6, %v3600_v62, 0.0  ;;  %v1698_v9 = vpop.permute.xlu1 %1697 }
 0xa64   :  { %1461 = vadd.xlane.f32.xlu0 %v1460_v63 }
 0xa7a   :  { %1619 = vrot.lane.b32.xlu0 %v3806_v42, %s3680_s23 }
 0xaed   :  { %v1459_v0 = vpop.xlane.xlu0 %1458 }
 0xaee   :  { %3601 = vrcp.f32 %v1459_v0 }
 0xaf1   :  { %v1462_v1 = vpop.xlane.xlu0 %1461 }
 0xaf2   :  { %3603 = vrcp.f32 %v1462_v1 }
 0xaf5   :  { %v1620_v8 = vpop.permute.xlu0 %1619 }
 0xaf8   :  { %v3602_v3 = vpop.eup %3601 }
 0xaf9   :  { %v1465_v4 = vmul.f32 %v3602_v3, %v3598_v58 }
 0xafb   :  { %3429 = vmatmul.mubr.msk.f32.vlgmr.msra.gmra.mrb[16].mxu1 %vm299_vm6, %v1465_v4 }
 0xafc   :  { %v3604_v5 = vpop.eup %3603  ;;  %3437 = vmatpush3.xpose.msk.msra.mxu1 %vm299_vm6, %v1622_v2  ;;  %3438 = vmatprep.mubr.msk.f32.mxu1 %vm3671_vm4, %v3670_v13 }
 0xafd   :  { %v1466_v7 = vmul.f32 %v3604_v5, %v3600_v62  ;;  %3446 = vmatprep.subr.mxu1 %v3670_v13 }
 0xaff   :  { %3434 = vmatmul.mubr.msk.f32.vlgmr.msra.gmra.mrb[22].mxu0 %vm299_vm6, %v1466_v7  ;;  %3439 = vmatmul.mubr.msk.f32.vlgmr.msra.gmra.mrb[18].mxu1 %vm299_vm6, %v1620_v8 }
 0xb00   :  { %3442 = vmatpush3.xpose.msk.msra.mxu0 %vm299_vm6, %v1700_v6  ;;  %3443 = vmatprep.mubr.msk.f32.mxu0 %vm3671_vm4, %v3670_v13 }
 0xb01   :  { %3451 = vmatprep.subr.mxu0 %v3670_v13  ;;  %3448 = vmatprep.mubr.msk.f32.mxu1 %vm3671_vm4, %v3670_v13 }
 0xb03   :  { %3444 = vmatmul.mubr.msk.f32.vlgmr.msra.gmra.mrb[24].mxu0 %vm299_vm6, %v1698_v9 }
 0xb04   :  { %3453 = vmatprep.mubr.msk.f32.mxu0 %vm3671_vm4, %v3670_v13 }
 0xbce   :  { %v3976_v10 = vpop.f32.mrb[16].mxu1 }
 0xbcf   :  { %v3430_v11 = vpop.f32.mrb[17].mxu1 }
 0xbd2   :  { %v3978_v12 = vpop.f32.mrb[22].mxu0  ;;  %v1693_v14 = vpop.f32.mrb[18].mxu1 }
 0xbd3   :  { %v1775_v15 = vmul.f32 0.35355338, %v1693_v14  ;;  %v3435_v16 = vpop.f32.mrb[23].mxu0  ;;  %v3440_v17 = vpop.f32.mrb[19].mxu1 }
 0xbd5   :  { %v1777_v18 = vsel %vm299_vm6, %v1775_v15, -inf }
 0xbd6   :  { %1778 = vmax.xlane.f32.xlu0 %v1777_v18  ;;  %v1771_v20 = vpop.f32.mrb[24].mxu0 }
 0xbd7   :  { %v1776_v22 = vmul.f32 0.35355338, %v1771_v20  ;;  %v3445_v23 = vpop.f32.mrb[25].mxu0 }
 0xbd9   :  { %v1780_v24 = vsel %vm299_vm6, %v1776_v22, -inf }
 0xbda   :  { %1781 = vmax.xlane.f32.xlu1 %v1780_v24 }
 0xbeb   :  { %1799 = vrot.lane.b32.xlu1 %v3808_v45, %s3680_s23 }
 0xbec   :  { %1875 = vrot.lane.b32.xlu0 %v3813_v50, %s3680_s23 }
 0xbef   :  { %1953 = vrot.lane.b32.xlu1 %v3806_v42, %s3681_s24 }
 0xbf3   :  { %2031 = vrot.lane.b32.xlu1 %v3816_v51, %s3681_s24 }
 0xbf7   :  { %2029 = vrot.lane.b32.xlu1 %v3816_v51, %s3682_s25 }
 0xc63   :  { %v1779_v25 = vpop.xlane.xlu0 %1778 }
 0xc64   :  { %v1783_v26 = vsub.f32 %v1775_v15, %v1779_v25 }
 0xc66   :  { %v1785_v27 = vmul.f32 1.442695, %v1783_v26 }
 0xc67   :  { %v1876_v28 = vpop.permute.xlu0 %1875  ;;  %v1782_v29 = vpop.xlane.xlu1 %1781 }
 0xc68   :  { %3605 = vpow2.f32 %v1785_v27  ;;  %v1784_v30 = vsub.f32 %v1776_v22, %v1782_v29  ;;  %3452 = vmatpush3.msra.mxu0 %v1876_v28 }
 0xc69   :  { %3461 = vmatprep.subr.mxu0 %v3670_v13 }
 0xc6a   :  { %v1787_v31 = vmul.f32 1.442695, %v1784_v30 }
 0xc6b   :  { %v1800_v33 = vpop.permute.xlu1 %1799 }
 0xc6c   :  { %3607 = vpow2.f32 %v1787_v31  ;;  %3447 = vmatpush3.msra.mxu1 %v1800_v33 }
 0xc6d   :  { %3456 = vmatprep.subr.mxu1 %v3670_v13 }
 0xc6f   :  { %v1954_v43 = vpop.permute.xlu1 %1953 }
 0xc72   :  { %v3606_v35 = vpop.eup %3605 }
 0xc73   :  { %v1789_v36 = vsel %vm299_vm6, %v3606_v35, 0.0  ;;  %v2032_v49 = vpop.permute.xlu1 %2031 }
 0xc74   :  { %1790 = vadd.xlane.f32.xlu0 %v1789_v36 }
 0xc76   :  { %v3608_v37 = vpop.eup %3607 }
 0xc77   :  { %v1792_v38 = vsel %vm299_vm6, %v3608_v37, 0.0  ;;  %v2030_v54 = vpop.permute.xlu1 %2029 }
 0xc78   :  { %1793 = vadd.xlane.f32.xlu0 %v1792_v38 }
 0xc8e   :  { %1951 = vrot.lane.b32.xlu0 %v3806_v42, %s3682_s25 }
 0xd01   :  { %v1791_v39 = vpop.xlane.xlu0 %1790 }
 0xd02   :  { %3609 = vrcp.f32 %v1791_v39 }
 0xd05   :  { %v1794_v41 = vpop.xlane.xlu0 %1793 }
 0xd06   :  { %3611 = vrcp.f32 %v1794_v41 }
 0xd09   :  { %v1952_v53 = vpop.permute.xlu0 %1951 }
 0xd0c   :  { %v3610_v44 = vpop.eup %3609 }
 0xd0d   :  { %v1797_v47 = vmul.f32 %v3610_v44, %v3606_v35 }
 0xd0f   :  { %3449 = vmatmul.mubr.msk.f32.vlgmr.msra.gmra.mrb[20].mxu1 %vm299_vm6, %v1797_v47 }
 0xd10   :  { %v3612_v48 = vpop.eup %3611  ;;  %3457 = vmatpush3.xpose.msk.msra.mxu1 %vm299_vm6, %v1954_v43  ;;  %3458 = vmatprep.mubr.msk.f32.mxu1 %vm3671_vm4, %v3670_v13 }
 0xd11   :  { %v1798_v52 = vmul.f32 %v3612_v48, %v3608_v37  ;;  %3466 = vmatprep.subr.mxu1 %v3670_v13 }
 0xd13   :  { %3454 = vmatmul.mubr.msk.f32.vlgmr.msra.gmra.mrb[26].mxu0 %vm299_vm6, %v1798_v52  ;;  %3459 = vmatmul.mubr.msk.f32.vlgmr.msra.gmra.mrb[22].mxu1 %vm299_vm6, %v1952_v53 }
 0xd14   :  { %3462 = vmatpush3.xpose.msk.msra.mxu0 %vm299_vm6, %v2032_v49  ;;  %3463 = vmatprep.mubr.msk.f32.mxu0 %vm3671_vm4, %v3670_v13 }
 0xd15   :  { %3471 = vmatprep.subr.mxu0 %v3670_v13  ;;  %3468 = vmatprep.mubr.msk.f32.mxu1 %vm3671_vm4, %v3670_v13 }
 0xd17   :  { %3464 = vmatmul.mubr.msk.f32.vlgmr.msra.gmra.mrb[28].mxu0 %vm299_vm6, %v2030_v54 }
 0xd18   :  { %3473 = vmatprep.mubr.msk.f32.mxu0 %vm3671_vm4, %v3670_v13 }
 0xde2   :  { %v4014_v55 = vpop.f32.mrb[20].mxu1 }
 0xde3   :  { %v3450_v56 = vpop.f32.mrb[21].mxu1 }
 0xde6   :  { %v4016_v57 = vpop.f32.mrb[26].mxu0  ;;  %v2025_v58 = vpop.f32.mrb[22].mxu1 }
 0xde7   :  { %v2107_v60 = vmul.f32 0.35355338, %v2025_v58  ;;  %v3455_v62 = vpop.f32.mrb[27].mxu0  ;;  %v3460_v63 = vpop.f32.mrb[23].mxu1 }
 0xde9   :  { %v2109_v0 = vsel %vm299_vm6, %v2107_v60, -inf }
 0xdea   :  { %2110 = vmax.xlane.f32.xlu0 %v2109_v0  ;;  %v2103_v1 = vpop.f32.mrb[28].mxu0 }
 0xdeb   :  { %v2108_v2 = vmul.f32 0.35355338, %v2103_v1  ;;  %v3465_v3 = vpop.f32.mrb[29].mxu0 }
 0xded   :  { %v2112_v4 = vsel %vm299_vm6, %v2108_v2, -inf }
 0xdee   :  { %2113 = vmax.xlane.f32.xlu1 %v2112_v4 }
 0xdff   :  { %2131 = vrot.lane.b32.xlu1 %v3808_v45, %s3682_s25 }
 0xe00   :  { %2207 = vrot.lane.b32.xlu0 %v3813_v50, %s3682_s25 }
 0xe03   :  { %2285 = vrot.lane.b32.xlu1 %v3806_v42, %s3683_s1 }
 0xe07   :  { %2363 = vrot.lane.b32.xlu1 %v3816_v51, %s3683_s1 }
 0xe0b   :  { %2361 = vrot.lane.b32.xlu1 %v3816_v51, %s3684_s26 }
 0xe77   :  { %v2111_v5 = vpop.xlane.xlu0 %2110 }
 0xe78   :  { %v2115_v6 = vsub.f32 %v2107_v60, %v2111_v5 }
 0xe7a   :  { %v2117_v7 = vmul.f32 1.442695, %v2115_v6 }
 0xe7b   :  { %v2208_v8 = vpop.permute.xlu0 %2207  ;;  %v2114_v9 = vpop.xlane.xlu1 %2113 }
 0xe7c   :  { %3613 = vpow2.f32 %v2117_v7  ;;  %v2116_v11 = vsub.f32 %v2108_v2, %v2114_v9  ;;  %3472 = vmatpush3.msra.mxu0 %v2208_v8 }
 0xe7d   :  { %3481 = vmatprep.subr.mxu0 %v3670_v13 }
 0xe7e   :  { %v2119_v14 = vmul.f32 1.442695, %v2116_v11 }
 0xe7f   :  { %v2132_v15 = vpop.permute.xlu1 %2131 }
 0xe80   :  { %3615 = vpow2.f32 %v2119_v14  ;;  %3467 = vmatpush3.msra.mxu1 %v2132_v15 }
 0xe81   :  { %3476 = vmatprep.subr.mxu1 %v3670_v13 }
 0xe83   :  { %v2286_v24 = vpop.permute.xlu1 %2285 }
 0xe86   :  { %v3614_v16 = vpop.eup %3613 }
 0xe87   :  { %v2121_v17 = vsel %vm299_vm6, %v3614_v16, 0.0  ;;  %v2364_v28 = vpop.permute.xlu1 %2363 }
 0xe88   :  { %2122 = vadd.xlane.f32.xlu0 %v2121_v17 }
 0xe8a   :  { %v3616_v18 = vpop.eup %3615 }
 0xe8b   :  { %v2124_v20 = vsel %vm299_vm6, %v3616_v18, 0.0  ;;  %v2362_v31 = vpop.permute.xlu1 %2361 }
 0xe8c   :  { %2125 = vadd.xlane.f32.xlu0 %v2124_v20 }
 0xea2   :  { %2283 = vrot.lane.b32.xlu0 %v3806_v42, %s3684_s26 }
 0xf15   :  { %v2123_v22 = vpop.xlane.xlu0 %2122 }
 0xf16   :  { %3617 = vrcp.f32 %v2123_v22 }
 0xf19   :  { %v2126_v23 = vpop.xlane.xlu0 %2125 }
 0xf1a   :  { %3619 = vrcp.f32 %v2126_v23 }
 0xf1d   :  { %v2284_v30 = vpop.permute.xlu0 %2283 }
 0xf20   :  { %v3618_v25 = vpop.eup %3617 }
 0xf21   :  { %v2129_v26 = vmul.f32 %v3618_v25, %v3614_v16 }
 0xf23   :  { %3469 = vmatmul.mubr.msk.f32.vlgmr.msra.gmra.mrb[24].mxu1 %vm299_vm6, %v2129_v26 }
 0xf24   :  { %v3620_v27 = vpop.eup %3619  ;;  %3477 = vmatpush3.xpose.msk.msra.mxu1 %vm299_vm6, %v2286_v24  ;;  %3478 = vmatprep.mubr.msk.f32.mxu1 %vm3671_vm4, %v3670_v13 }
 0xf25   :  { %v2130_v29 = vmul.f32 %v3620_v27, %v3616_v18  ;;  %3486 = vmatprep.subr.mxu1 %v3670_v13 }
 0xf27   :  { %3474 = vmatmul.mubr.msk.f32.vlgmr.msra.gmra.mrb[30].mxu0 %vm299_vm6, %v2130_v29  ;;  %3479 = vmatmul.mubr.msk.f32.vlgmr.msra.gmra.mrb[26].mxu1 %vm299_vm6, %v2284_v30 }
 0xf28   :  { %3482 = vmatpush3.xpose.msk.msra.mxu0 %vm299_vm6, %v2364_v28  ;;  %3483 = vmatprep.mubr.msk.f32.mxu0 %vm3671_vm4, %v3670_v13 }
 0xf29   :  { %3491 = vmatprep.subr.mxu0 %v3670_v13  ;;  %3488 = vmatprep.mubr.msk.f32.mxu1 %vm3671_vm4, %v3670_v13 }
 0xf2b   :  { %3484 = vmatmul.mubr.msk.f32.vlgmr.msra.gmra.mrb[32].mxu0 %vm299_vm6, %v2362_v31 }
 0xf2c   :  { %3493 = vmatprep.mubr.msk.f32.mxu0 %vm3671_vm4, %v3670_v13 }
 0xff6   :  { %v4052_v33 = vpop.f32.mrb[24].mxu1 }
 0xff7   :  { %v3470_v35 = vpop.f32.mrb[25].mxu1 }
 0xffa   :  { %v4054_v36 = vpop.f32.mrb[30].mxu0  ;;  %v2357_v37 = vpop.f32.mrb[26].mxu1 }
 0xffb   :  { %v2439_v38 = vmul.f32 0.35355338, %v2357_v37  ;;  %v3475_v39 = vpop.f32.mrb[31].mxu0  ;;  %v3480_v41 = vpop.f32.mrb[27].mxu1 }
 0xffd   :  { %v2441_v43 = vsel %vm299_vm6, %v2439_v38, -inf }
 0xffe   :  { %2442 = vmax.xlane.f32.xlu0 %v2441_v43  ;;  %v2435_v44 = vpop.f32.mrb[32].mxu0 }
 0xfff   :  { %v2440_v47 = vmul.f32 0.35355338, %v2435_v44  ;;  %v3485_v48 = vpop.f32.mrb[33].mxu0 }
0x1001   :  { %v2444_v49 = vsel %vm299_vm6, %v2440_v47, -inf }
0x1002   :  { %2445 = vmax.xlane.f32.xlu1 %v2444_v49 }
0x1013   :  { %2463 = vrot.lane.b32.xlu1 %v3808_v45, %s3684_s26 }
0x1014   :  { %2539 = vrot.lane.b32.xlu0 %v3813_v50, %s3684_s26 }
0x1017   :  { %2617 = vrot.lane.b32.xlu1 %v3806_v42, %s3685_s27 }
0x101b   :  { %2695 = vrot.lane.b32.xlu1 %v3816_v51, %s3685_s27 }
0x101f   :  { %2693 = vrot.lane.b32.xlu1 %v3816_v51, %s3686_s28 }
0x108b   :  { %v2443_v52 = vpop.xlane.xlu0 %2442 }
0x108c   :  { %v2447_v53 = vsub.f32 %v2439_v38, %v2443_v52 }
0x108e   :  { %v2449_v54 = vmul.f32 1.442695, %v2447_v53 }
0x108f   :  { %v2540_v56 = vpop.permute.xlu0 %2539  ;;  %v2446_v58 = vpop.xlane.xlu1 %2445 }
0x1090   :  { %3621 = vpow2.f32 %v2449_v54  ;;  %v2448_v60 = vsub.f32 %v2440_v47, %v2446_v58  ;;  %3492 = vmatpush3.msra.mxu0 %v2540_v56 }
0x1091   :  { %3501 = vmatprep.subr.mxu0 %v3670_v13 }
0x1092   :  { %v2451_v62 = vmul.f32 1.442695, %v2448_v60 }
0x1093   :  { %v2464_v63 = vpop.permute.xlu1 %2463 }
0x1094   :  { %3623 = vpow2.f32 %v2451_v62  ;;  %3487 = vmatpush3.msra.mxu1 %v2464_v63 }
0x1095   :  { %3496 = vmatprep.subr.mxu1 %v3670_v13 }
0x1097   :  { %v2618_v5 = vpop.permute.xlu1 %2617 }
0x109a   :  { %v3622_v0 = vpop.eup %3621 }
0x109b   :  { %v2453_v1 = vsel %vm299_vm6, %v3622_v0, 0.0  ;;  %v2696_v9 = vpop.permute.xlu1 %2695 }
0x109c   :  { %2454 = vadd.xlane.f32.xlu0 %v2453_v1 }
0x109e   :  { %v3624_v51 = vpop.eup %3623 }
0x109f   :  { %v2456_v2 = vsel %vm299_vm6, %v3624_v51, 0.0  ;;  %v2694_v14 = vpop.permute.xlu1 %2693 }
0x10a0   :  { %2457 = vadd.xlane.f32.xlu0 %v2456_v2 }
0x10b6   :  { %2615 = vrot.lane.b32.xlu0 %v3806_v42, %s3686_s28 }
0x1129   :  { %v2455_v3 = vpop.xlane.xlu0 %2454 }
0x112a   :  { %3625 = vrcp.f32 %v2455_v3 }
0x112d   :  { %v2458_v4 = vpop.xlane.xlu0 %2457 }
0x112e   :  { %3627 = vrcp.f32 %v2458_v4 }
0x1131   :  { %v2616_v42 = vpop.permute.xlu0 %2615 }
0x1134   :  { %v3626_v6 = vpop.eup %3625 }
0x1135   :  { %v2461_v7 = vmul.f32 %v3626_v6, %v3622_v0 }
0x1137   :  { %3489 = vmatmul.mubr.msk.f32.vlgmr.msra.gmra.mrb[28].mxu1 %vm299_vm6, %v2461_v7 }
0x1138   :  { %v3628_v8 = vpop.eup %3627  ;;  %3497 = vmatpush3.xpose.msk.msra.mxu1 %vm299_vm6, %v2618_v5  ;;  %3498 = vmatprep.mubr.msk.f32.mxu1 %vm3671_vm4, %v3670_v13 }
0x1139   :  { %v2462_v11 = vmul.f32 %v3628_v8, %v3624_v51  ;;  %3506 = vmatprep.subr.mxu1 %v3670_v13 }
0x113b   :  { %3494 = vmatmul.mubr.msk.f32.vlgmr.msra.gmra.mrb[34].mxu0 %vm299_vm6, %v2462_v11  ;;  %3499 = vmatmul.mubr.msk.f32.vlgmr.msra.gmra.mrb[30].mxu1 %vm299_vm6, %v2616_v42 }
0x113c   :  { %3502 = vmatpush3.xpose.msk.msra.mxu0 %vm299_vm6, %v2696_v9  ;;  %3503 = vmatprep.mubr.msk.f32.mxu0 %vm3671_vm4, %v3670_v13 }
0x113d   :  { %3511 = vmatprep.subr.mxu0 %v3670_v13  ;;  %3508 = vmatprep.mubr.msk.f32.mxu1 %vm3671_vm4, %v3670_v13 }
0x113f   :  { %3504 = vmatmul.mubr.msk.f32.vlgmr.msra.gmra.mrb[36].mxu0 %vm299_vm6, %v2694_v14 }
0x1140   :  { %3513 = vmatprep.mubr.msk.f32.mxu0 %vm3671_vm4, %v3670_v13 }
0x120a   :  { %v2535_v15 = vpop.f32.mrb[28].mxu1 }
0x120b   :  { %v3490_v16 = vpop.f32.mrb[29].mxu1 }
0x120e   :  { %v2611_v17 = vpop.f32.mrb[34].mxu0  ;;  %v2689_v18 = vpop.f32.mrb[30].mxu1 }
0x120f   :  { %v2771_v20 = vmul.f32 0.35355338, %v2689_v18  ;;  %v3495_v22 = vpop.f32.mrb[35].mxu0  ;;  %v3500_v23 = vpop.f32.mrb[31].mxu1 }
0x1211   :  { %v2773_v24 = vsel %vm299_vm6, %v2771_v20, -inf }
0x1212   :  { %2774 = vmax.xlane.f32.xlu0 %v2773_v24  ;;  %v2767_v25 = vpop.f32.mrb[36].mxu0 }
0x1213   :  { %v2772_v26 = vmul.f32 0.35355338, %v2767_v25  ;;  %v3505_v27 = vpop.f32.mrb[37].mxu0 }
0x1215   :  { %v2776_v28 = vsel %vm299_vm6, %v2772_v26, -inf }
0x1216   :  { %2777 = vmax.xlane.f32.xlu1 %v2776_v28 }
0x1227   :  { %2795 = vrot.lane.b32.xlu1 %v3808_v45, %s3686_s28 }
0x122b   :  { %2949 = vrot.lane.b32.xlu1 %v3900_v59, %s3685_s27 }
0x122f   :  { %2951 = vrot.lane.b32.xlu1 %v3902_v61, %s3685_s27 }
0x1233   :  { %2959 = vrot.lane.b32.xlu1 %v3940_v34, %s3683_s1 }
0x1237   :  { %2967 = vrot.lane.b32.xlu1 %v3978_v12, %s3681_s24 }
0x123b   :  { %2975 = vrot.lane.b32.xlu1 %v4016_v57, %s3679_s0 }
0x123f   :  { %2983 = vrot.lane.b32.xlu1 %v4054_v36, %s3677_s21 }
0x1243   :  { %2991 = vrot.lane.b32.xlu1 %v2611_v17, %s3675_s19 }
0x129f   :  { %v2775_v45 = vpop.xlane.xlu0 %2774 }
0x12a0   :  { %v2779_v29 = vsub.f32 %v2771_v20, %v2775_v45 }
0x12a2   :  { %v2781_v59 = vmul.f32 1.442695, %v2779_v29  ;;  %v3569_v29 = vld [vmem:[%s4189_s7] sm:$0xff]  }
0x12a3   :  { %v2778_v30 = vpop.xlane.xlu1 %2777 }
0x12a4   :  { %3629 = vpow2.f32 %v2781_v59  ;;  %v2780_v61 = vsub.f32 %v2772_v26, %v2778_v30  ;;  %v3570_v59 = vld [vmem:[%s4189_s7 + $0x8] sm:$0xff]   ;;  %v3571_v30 = vld [vmem:[%s4189_s7 + $0x10] sm:$0xff]  }
0x12a6   :  { %v2783_v31 = vmul.f32 1.442695, %v2780_v61  ;;  %v3572_v61 = vld [vmem:[%s4189_s7 + $0x18] sm:$0xff]  }
0x12a7   :  { %v2796_v35 = vpop.permute.xlu1 %2795 }
0x12a8   :  { %3631 = vpow2.f32 %v2783_v31  ;;  %3507 = vmatpush3.msra.mxu1 %v2796_v35 }
0x12a9   :  { %3516 = vmatprep.subr.bf16.mxu1 %v3670_v13 }
0x12ab   :  { %v2950_v47 = vpop.permute.xlu1 %2949 }
0x12ac   :  { %v3003_v63 = vsel %vm299_vm6, %v3862_v19, %v2950_v47 }
0x12ae   :  { %v3630_v34 = vpop.eup %3629 }
0x12af   :  { %v2785_v12 = vsel %vm299_vm6, %v3630_v34, 0.0  ;;  %v2952_v48 = vpop.permute.xlu1 %2951 }
0x12b0   :  { %2786 = vadd.xlane.f32.xlu0 %v2785_v12  ;;  %v3004_v3 = vsel %vm299_vm6, %v3864_v21, %v2952_v48 }
0x12b2   :  { %v3632_v57 = vpop.eup %3631 }
0x12b3   :  { %v2788_v36 = vsel %vm299_vm6, %v3632_v57, 0.0  ;;  %v2960_v52 = vpop.permute.xlu1 %2959 }
0x12b4   :  { %2789 = vadd.xlane.f32.xlu0 %v2788_v36  ;;  %v3007_v5 = vsel %vm3005_vm7, %v3004_v3, %v2960_v52 }
0x12b7   :  { %v2968_v54 = vpop.permute.xlu1 %2967 }
0x12b8   :  { %v3010_v19 = vsel %vm3008_vm8, %v3007_v5, %v2968_v54 }
0x12bb   :  { %v2976_v58 = vpop.permute.xlu1 %2975 }
0x12bc   :  { %v3012_v11 = vsel %vm172_vm5, %v3010_v19, %v2976_v58 }
0x12bf   :  { %v2984_v62 = vpop.permute.xlu1 %2983 }
0x12c0   :  { %v3015_v14 = vsel %vm3013_vm9, %v3012_v11, %v2984_v62 }
0x12c3   :  { %v2992_v6 = vpop.permute.xlu1 %2991 }
0x12ca   :  { %2871 = vrot.lane.b32.xlu0 %v3813_v50, %s3686_s28 }
0x12ce   :  { %2957 = vrot.lane.b32.xlu0 %v3938_v32, %s3683_s1 }
0x12d2   :  { %2965 = vrot.lane.b32.xlu0 %v3976_v10, %s3681_s24 }
0x12d6   :  { %2973 = vrot.lane.b32.xlu0 %v4014_v55, %s3679_s0 }
0x12da   :  { %2981 = vrot.lane.b32.xlu0 %v4052_v33, %s3677_s21 }
0x12de   :  { %2989 = vrot.lane.b32.xlu0 %v2535_v15, %s3675_s19  ;;  %v3018_v15 = vsel %vm3016_vm11, %v3015_v14, %v2992_v6 }
0x133d   :  { %v2787_v37 = vpop.xlane.xlu0 %2786 }
0x133e   :  { %3633 = vrcp.f32 %v2787_v37 }
0x1341   :  { %v2790_v38 = vpop.xlane.xlu0 %2789 }
0x1342   :  { %3635 = vrcp.f32 %v2790_v38  ;;  %v3187_v38 = vld [vmem:[%s4186_s4] ss:$0 sm:$0xff]  ;;  %s3687_s4 = smov [#allocation2]  }
0x1345   :  { %v2872_v39 = vpop.permute.xlu0 %2871 }
0x1346   :  { %3512 = vmatpush3.msra.mxu0 %v2872_v39 }
0x1348   :  { %v3634_v50 = vpop.eup %3633 }
0x1349   :  { %v2793_v41 = vmul.f32 %v3634_v50, %v3630_v34  ;;  %v2958_v49 = vpop.permute.xlu0 %2957 }
0x134a   :  { %v3006_v0 = vsel %vm3005_vm7, %v3003_v63, %v2958_v49 }
0x134b   :  { %3509 = vmatmul.mubr.msk.f32.vlgmr.msra.gmra.mrb[32].mxu1 %vm299_vm6, %v2793_v41  ;;  %v211_v41 = vadd.f32 %v3187_v38, %v3804_v40 }
0x134c   :  { %v3636_v32 = vpop.eup %3635  ;;  %3524 = vmatprep.mubr.msk.bf16.mxu1 %vm3671_vm4, %v3670_v13  ;;  %3517 = vmatpush3.bf16.msra.mxu1 %v3569_v29 }
0x134d   :  { %v2794_v10 = vmul.f32 %v3636_v32, %v3632_v57  ;;  %v2966_v53 = vpop.permute.xlu0 %2965  ;;  %3518 = vmatprep.subr.bf16.mxu1 %v3670_v13 }
0x134e   :  { %v3009_v51 = vsel %vm3008_vm8, %v3006_v0, %v2966_v53 }
0x134f   :  { %3514 = vmatmul.mubr.msk.f32.vlgmr.msra.gmra.mrb[38].mxu0 %vm299_vm6, %v2794_v10 }
0x1350   :  { %3519 = vmatpush3.bf16.msra.mxu1 %v3570_v59 }
0x1351   :  { %v2974_v56 = vpop.permute.xlu0 %2973  ;;  %3520 = vmatprep.subr.bf16.mxu1 %v3670_v13 }
0x1352   :  { %v3011_v2 = vsel %vm172_vm5, %v3009_v51, %v2974_v56 }
0x1354   :  { %3521 = vmatpush3.bf16.msra.mxu1 %v3571_v30 }
0x1355   :  { %v2982_v60 = vpop.permute.xlu0 %2981  ;;  %3522 = vmatprep.subr.bf16.mxu1 %v3670_v13  ;;  %v214_v13 = vadd.f32 %v3187_v38, %v3810_v46 }
0x1356   :  { %v3014_v4 = vsel %vm3013_vm9, %v3011_v2, %v2982_v60 }
0x1358   :  { %3523 = vmatpush3.bf16.msra.mxu1 %v3572_v61 }
0x1359   :  { %v2990_v1 = vpop.permute.xlu0 %2989 }
0x135a   :  { %v3017_v7 = vsel %vm3016_vm11, %v3014_v4, %v2990_v1 }
0x141e   :  { %v2867_v55 = vpop.f32.mrb[32].mxu1 }
0x141f   :  { %2997 = vrot.lane.b32.xlu0 %v2867_v55, %s3673_s6  ;;  %v3510_v33 = vpop.f32.mrb[33].mxu1 }
0x1422   :  { %v2943_v43 = vpop.f32.mrb[38].mxu0 }
0x1423   :  { %2999 = vrot.lane.b32.xlu1 %v2943_v43, %s3673_s6  ;;  %v3515_v44 = vpop.f32.mrb[39].mxu0  ;;  %v3244_v43 = vld [vmem:[%s4190_s8] ss:$0 sm:$0xff]  ;;  %s3171_s8 = sshll.u32 %s3687_s4, 4  ;;  %s3172_s8 = int_to_ptr.vmem [resolvable:$true] %s3171_s8 }
0x1424   :  { %s3645_s3 = scalar_lea.vmem %s3172_s8, 256  ;;  %p3650_p1 = scmp.lt.s32.totalorder %s3172_s8, %s3172_s8 }
0x1425   :  { %p3646_p0 = scmp.ne.s32.totalorder %s3172_s8, %s3645_s3  ;;  %p3651_p2 = scmp.lt.s32.totalorder %s3645_s3, %s3645_s3 }
0x1427   :  { %p3652_p3 = por %p3651_p2, %p3650_p1 }
0x1429   :  { %p3653_p4 = pnand %p3652_p3, %p3646_p0 }
0x1491   :  { %v2998_v8 = vpop.permute.xlu0 %2997 }
0x1492   :  { %v3020_v9 = vsel %vm3019_vm10, %v3017_v7, %v2998_v8 }
0x1493   :  { %v3023_v42 = vsel %vm3022_vm12, %v3020_v9, 0.0 }
0x1494   :  { %3024 = vadd.xlane.f32.xlu0 %v3023_v42 }
0x1495   :  { %v3000_v16 = vpop.permute.xlu1 %2999 }
0x1496   :  { %v3021_v21 = vsel %vm3019_vm10, %v3018_v15, %v3000_v16 }
0x1497   :  { %v3026_v17 = vsel %vm3022_vm12, %v3021_v21, 0.0 }
0x1498   :  { %3027 = vadd.xlane.f32.xlu1 %v3026_v17 }
0x1521   :  { %v3025_v18 = vpop.xlane.xlu0 %3024 }
0x1522   :  { %v3030_v20 = vmul.f32 0.015625, %v3025_v18 }
0x1524   :  { %v3032_v22 = vsub.f32 %v3020_v9, %v3030_v20 }
0x1525   :  { %v3028_v23 = vpop.xlane.xlu1 %3027 }
0x1526   :  { %v3031_v24 = vmul.f32 0.015625, %v3028_v23  ;;  %v3034_v25 = vmul.f32 %v3032_v22, %v3032_v22 }
0x1528   :  { %v3033_v26 = vsub.f32 %v3021_v21, %v3031_v24  ;;  %v3036_v27 = vsel %vm3022_vm12, %v3034_v25, 0.0 }
0x1529   :  { %3037 = vadd.xlane.f32.xlu0 %v3036_v27 }
0x152a   :  { %v3035_v28 = vmul.f32 %v3033_v26, %v3033_v26 }
0x152c   :  { %v3039_v45 = vsel %vm3022_vm12, %v3035_v28, 0.0 }
0x152d   :  { %3040 = vadd.xlane.f32.xlu0 %v3039_v45 }
0x15b6   :  { %v3038_v31 = vpop.xlane.xlu0 %3037 }
0x15b7   :  { %v3042_v35 = vmul.f32 0.015625, %v3038_v31 }
0x15b9   :  { %v3044_v34 = vadd.f32 1e-05, %v3042_v35 }
0x15ba   :  { %v3041_v12 = vpop.xlane.xlu0 %3040 }
0x15bb   :  { %3637 = vrsqrt.f32 %v3044_v34  ;;  %v3043_v57 = vmul.f32 0.015625, %v3041_v12 }
0x15bd   :  { %v3045_v36 = vadd.f32 1e-05, %v3043_v57 }
0x15bf   :  { %3639 = vrsqrt.f32 %v3045_v36 }
0x15c5   :  { %v3638_v37 = vpop.eup %3637 }
0x15c6   :  { %v3048_v39 = vmul.f32 %v3638_v37, %v3032_v22 }
0x15c8   :  { %v3050_v10 = vadd.f32 %v3048_v39, %v211_v41 }
0x15c9   :  { %v3640_v50 = vpop.eup %3639 }
0x15ca   :  { %v3049_v32 = vmul.f32 %v3640_v50, %v3033_v26 }
0x15cc   :  { %v3051_v55 = vadd.f32 %v3049_v32, %v214_v13 }
0x15ce   :  { %v3052_v33 = vpack.c.bf16 %v3051_v55, %v3050_v10 }
0x15d0   :  { %3525 = vmatmul.mubr.msk.bf16.vlgmr.msra.gmra.mrb[36].mxu1 %vm3022_vm12, %v3052_v33 }
0x16a3   :  { %v3129_v44 = vpop.f32.mrb[36].mxu1 }
0x16a4   :  { %v3130_v47 = vadd.f32 %v3244_v43, %v3129_v44  ;;  %v3526_v48 = vpop.f32.mrb[37].mxu1 }
0x16a5   :  { %v3132_v49 = vpop.f32.mrb[38].mxu1 }
0x16a6   :  { %v3133_v52 = vadd.f32 %v3244_v43, %v3132_v49  ;;  %v3527_v53 = vpop.f32.mrb[39].mxu1  ;;  %v3136_v40 = vsel %vm3022_vm12, %v3130_v47, 0.0 }
0x16a7   :  { %3137 = vadd.xlane.f32.xlu1 %v3136_v40 }
0x16a8   :  { %v3139_v46 = vsel %vm3022_vm12, %v3133_v52, 0.0 }
0x16a9   :  { %3140 = vadd.xlane.f32.xlu0 %v3139_v46 }
0x1734   :  { %v3138_v54 = vpop.xlane.xlu1 %3137 }
0x1735   :  { %v3142_v56 = vmul.f32 0.015625, %v3138_v54 }
0x1736   :  { %v3141_v58 = vpop.xlane.xlu0 %3140 }
0x1737   :  { %v3144_v60 = vsub.f32 %v3130_v47, %v3142_v56  ;;  %v3143_v62 = vmul.f32 0.015625, %v3141_v58 }
0x1739   :  { %v3145_v63 = vsub.f32 %v3133_v52, %v3143_v62  ;;  %v3146_v0 = vmul.f32 %v3144_v60, %v3144_v60 }
0x173b   :  { %v3148_v1 = vsel %vm3022_vm12, %v3146_v0, 0.0  ;;  %v3147_v51 = vmul.f32 %v3145_v63, %v3145_v63 }
0x173c   :  { %3149 = vadd.xlane.f32.xlu1 %v3148_v1 }
0x173d   :  { %v3151_v2 = vsel %vm3022_vm12, %v3147_v51, 0.0 }
0x173e   :  { %3152 = vadd.xlane.f32.xlu0 %v3151_v2 }
0x17c9   :  { %v3150_v3 = vpop.xlane.xlu1 %3149 }
0x17ca   :  { %v3154_v4 = vmul.f32 0.015625, %v3150_v3 }
0x17cb   :  { %v3153_v5 = vpop.xlane.xlu0 %3152 }
0x17cc   :  { %v3156_v6 = vadd.f32 1e-05, %v3154_v4  ;;  %v3155_v7 = vmul.f32 0.015625, %v3153_v5 }
0x17ce   :  { %3641 = vrsqrt.f32 %v3156_v6  ;;  %v3157_v8 = vadd.f32 1e-05, %v3155_v7 }
0x17d0   :  { %3643 = vrsqrt.f32 %v3157_v8 }
0x17d8   :  { %v3642_v19 = vpop.eup %3641 }
0x17d9   :  { %v3160_v9 = vmul.f32 %v3642_v19, %v3144_v60 }
0x17da   :  { %v3644_v11 = vpop.eup %3643 }
0x17db   :  { %v3161_v42 = vmul.f32 %v3644_v11, %v3145_v63  ;;  %v3162_v14 = vadd.f32 %v3160_v9, %v3050_v10 }
0x17dd   :  { %v3163_v15 = vadd.f32 %v3161_v42, %v3051_v55  ;;  %3164 = vst.msk [vmem:[#allocation2] sm:$0xff] %vm3022_vm12, %v3162_v14 }
0x17df   :  { %3165 = vst.msk [vmem:[#allocation2 + $0x8] sm:$0xff] %vm3022_vm12, %v3163_v15 }
0x17e0   :  { %3656 = shalt.err (!%p3653_p4)
}
0x17e1   :  { %s3657_s18 = scalar_lea.hbm %s4191_s9, 256 }
0x17e2   :  { %p3658_p5 = scmp.ne.s32.totalorder %s4191_s9, %s3657_s18  ;;  %p3661_p6 = scmp.lt.u32.totalorder %s3657_s18, %s4191_s9 }
0x17e4   :  { %p3663_p7 = pnand %p3661_p6, %p3658_p5 }
0x17e6   :  { %3666 = shalt.err (!%p3663_p7)
}
0x17e7   :  { %s3688_s0 = smov 128  }
0x17e8   :  { %3177 = dma.vmem_to_hbm [thread:$0]  %s3172_s8, 256, %s4191_s9, [#allocation3], %s3688_s0, %s3688_s0, %s3685_s27  }
0x17e9   :  { %3667 = dma.done.wait [#allocation3], 256  }
0x17ea   :  { %3668 = vsyncadd [#allocation3], 4294967040 }
0x17eb   :  { %3181 = vsyncpa [#allocation3], 1 }

</bundles_post_ra>
